<compile_context>
chip_gen: v7x
topology: tpu7x:2x2x1
jax: 0.10.0
libtpu: 0.0.40
codegen_flags: <defaults>
</compile_context>

<pallas_src>
import functools

import jax
import jax.numpy as jnp
from jax.experimental import pallas as pl
from jax.experimental.pallas import tpu as pltpu


MXU_DTYPE = jnp.bfloat16   # MXU operand dtype; accumulation is always f32.


# ----------------------------------------------------------------------------
# Fully fused per-batch kernel:
#   q = dw3x3(conv1x1(x)); kv = dw3x3(conv1x1(y)); channel attention; project.
# ----------------------------------------------------------------------------
def _mm_fused_kernel(H, W,
                     x_ref, y_ref,
                     qw_ref, qb_ref, qdw_ref, qdb_ref,
                     kvw_ref, kvb_ref, kvdw_ref, kvdb_ref,
                     temp_ref, bias_ref, prw_ref, prb_ref,
                     o_ref,
                     qpad_ref, kvpad_ref):
    f32 = jnp.float32
    HW = H * W
    C = o_ref.shape[1]

    def pointwise(inp, w_ref, b_ref):
        # 1x1 conv == channel matmul on the MXU (bf16 in, f32 accumulate).
        return jnp.dot(w_ref[...].astype(MXU_DTYPE), inp.astype(MXU_DTYPE),
                       preferred_element_type=f32) + b_ref[...]

    def dwconv3x3(pw, dw_ref, db_ref, pad_ref):
        # Depthwise 3x3 (stride 1, pad 1) on a (rows, HW) block.  The
        # pointwise result is stored once into a flat buffer with (W+1)
        # zero-halo lanes on each side so vertical taps read zeros outside
        # the image; horizontal taps additionally mask columns that would
        # wrap across a row boundary.
        rows = pw.shape[0]
        pad_ref[:, :W + 1] = jnp.zeros((rows, W + 1), f32)       # halo only
        pad_ref[:, W + 1 + HW:] = jnp.zeros((rows, W + 1), f32)  # halo only
        pad_ref[:, W + 1:W + 1 + HW] = pw

        lane = jax.lax.broadcasted_iota(jnp.int32, (rows, HW), 1)
        if W & (W - 1) == 0:                      # power-of-two fast path
            col = jnp.bitwise_and(lane, W - 1)
        else:
            col = lane % W
        left_ok = col >= 1
        right_ok = col <= W - 2

        wd = dw_ref[...]                           # (9, rows, 1): loaded once
        acc = jnp.zeros((rows, HW), f32)
        for dy in (-1, 0, 1):
            for dx in (-1, 0, 1):
                start = (dy + 1) * W + (dx + 1)
                tap = pad_ref[:, start:start + HW]                # (rows, HW)
                if dx == -1:
                    tap = jnp.where(left_ok, tap, 0.0)
                elif dx == 1:
                    tap = jnp.where(right_ok, tap, 0.0)
                acc = acc + tap * wd[(dy + 1) * 3 + (dx + 1)]     # (rows,1) bcast
        return acc + db_ref[...]

    # ---- q / kv branches (intermediates never leave VMEM) ------------------
    q = dwconv3x3(pointwise(x_ref[0], qw_ref, qb_ref),
                  qdw_ref, qdb_ref, qpad_ref)                     # (C, HW)
    kv = dwconv3x3(pointwise(y_ref[0], kvw_ref, kvb_ref),
                   kvdw_ref, kvdb_ref, kvpad_ref)                 # (2C, HW)
    k = kv[:C, :]
    v = kv[C:, :]

    # ---- all-heads channel attention ---------------------------------------
    eps2 = 1e-24                      # (torch F.normalize eps = 1e-12) ** 2
    qn = q * jax.lax.rsqrt(
        jnp.maximum(jnp.sum(q * q, axis=-1, keepdims=True), eps2))
    kn = k * jax.lax.rsqrt(
        jnp.maximum(jnp.sum(k * k, axis=-1, keepdims=True), eps2))

    logits = jax.lax.dot_general(               # q @ k^T over the spatial axis
        qn.astype(MXU_DTYPE), kn.astype(MXU_DTYPE),
        (((1,), (1,)), ((), ())), preferred_element_type=f32)      # (C, C)
    # per-row (per-head) temperature + block-diagonal mask (off-head -> -1e30)
    logits = logits * temp_ref[...] + bias_ref[...]
    logits = logits - jnp.max(logits, axis=-1, keepdims=True)
    p = jnp.exp(logits)
    probs = p * pl.reciprocal(jnp.sum(p, axis=-1, keepdims=True), approx=True)

    heads_out = jnp.dot(probs.astype(MXU_DTYPE), v.astype(MXU_DTYPE),
                        preferred_element_type=f32)                # (C, HW)

    # ---- fused output projection (1x1 conv) --------------------------------
    out = jnp.dot(prw_ref[...].astype(MXU_DTYPE),
                  heads_out.astype(MXU_DTYPE),
                  preferred_element_type=f32) + prb_ref[...]
    o_ref[0] = out.astype(o_ref.dtype)


def _mm_fused_call(x, y, qw, qb, qdw, qdb, kvw, kvb, kvdw, kvdb,
                   temp_col, attn_bias, prw, prb, H, W):
    B, C, HW = x.shape
    assert HW == H * W
    HWP = HW + 2 * W + 2
    kern = functools.partial(_mm_fused_kernel, H, W)

    def batch(i): return (i, 0, 0)
    def rep2(i): return (0, 0)
    def rep3(i): return (0, 0, 0)

    return pl.pallas_call(
        kern,
        out_shape=jax.ShapeDtypeStruct((B, C, HW), jnp.float32),
        grid=(B,),
        in_specs=[
            pl.BlockSpec((1, C, HW), batch),       # x
            pl.BlockSpec((1, C, HW), batch),       # y
            pl.BlockSpec((C, C), rep2),            # q 1x1 weight
            pl.BlockSpec((C, 1), rep2),            # q 1x1 bias
            pl.BlockSpec((9, C, 1), rep3),         # q dw weight
            pl.BlockSpec((C, 1), rep2),            # q dw bias
            pl.BlockSpec((2 * C, C), rep2),        # kv 1x1 weight
            pl.BlockSpec((2 * C, 1), rep2),        # kv 1x1 bias
            pl.BlockSpec((9, 2 * C, 1), rep3),     # kv dw weight
            pl.BlockSpec((2 * C, 1), rep2),        # kv dw bias
            pl.BlockSpec((C, 1), rep2),            # per-row temperature
            pl.BlockSpec((C, C), rep2),            # block-diagonal additive mask
            pl.BlockSpec((C, C), rep2),            # projection weight
            pl.BlockSpec((C, 1), rep2),            # projection bias
        ],
        out_specs=pl.BlockSpec((1, C, HW), batch),
        scratch_shapes=[pltpu.VMEM((C, HWP), jnp.float32),
                        pltpu.VMEM((2 * C, HWP), jnp.float32)],
        compiler_params=pltpu.CompilerParams(
            dimension_semantics=("parallel",)),
    )(x, y, qw, qb, qdw, qdb, kvw, kvb, kvdw, kvdb,
      temp_col, attn_bias, prw, prb)


# ----------------------------------------------------------------------------
# Parameter init (deterministic synthetic params, kernel-friendly layouts).
# ----------------------------------------------------------------------------
def init_params(key, dim, num_head):
    ks = jax.random.split(key, 10)
    s = 0.1
    return {
        # 1x1 conv weights stored (Cout, Cin); torch stores (Cout, Cin, 1, 1).
        "q_w":     jax.random.normal(ks[0], (dim, dim), jnp.float32) * s,
        "q_b":     jax.random.normal(ks[1], (dim, 1), jnp.float32) * s,
        # depthwise weights stored (9, C, 1) with tap t = ky*3 + kx.
        "q_dw_w":  jax.random.normal(ks[2], (9, dim, 1), jnp.float32) * s,
        "q_dw_b":  jax.random.normal(ks[3], (dim, 1), jnp.float32) * s,
        "kv_w":    jax.random.normal(ks[4], (2 * dim, dim), jnp.float32) * s,
        "kv_b":    jax.random.normal(ks[5], (2 * dim, 1), jnp.float32) * s,
        "kv_dw_w": jax.random.normal(ks[6], (9, 2 * dim, 1), jnp.float32) * s,
        "kv_dw_b": jax.random.normal(ks[7], (2 * dim, 1), jnp.float32) * s,
        "proj_w":  jax.random.normal(ks[8], (dim, dim), jnp.float32) * s,
        "proj_b":  jax.random.normal(ks[9], (dim, 1), jnp.float32) * s,
        # non-trivial per-head temperature so the scaling path is exercised.
        "temperature": jnp.linspace(0.5, 1.5, num_head).astype(jnp.float32),
    }


# ----------------------------------------------------------------------------
# Full forward pass of `mm` (takes / returns NCHW like the torch module).
# ----------------------------------------------------------------------------
def mm_forward(params, x_nchw, y_nchw, num_head):
    assert x_nchw.shape == y_nchw.shape, (
        "The shape of feature maps from image and features are not equal!")
    b, c, h, w = x_nchw.shape
    assert c % num_head == 0
    ch = c // num_head
    x = x_nchw.reshape(b, c, h * w)     # free reshapes (no transposes)
    y = y_nchw.reshape(b, c, h * w)

    # Tiny helpers built outside the kernel so the kernel is head-count
    # agnostic: per-row temperature column and block-diagonal additive mask.
    temp_col = jnp.repeat(params["temperature"], ch).reshape(c, 1)
    temp_col = temp_col.astype(jnp.float32)
    head_id = jnp.arange(c, dtype=jnp.int32) // ch
    attn_bias = jnp.where(head_id[:, None] == head_id[None, :],
                          0.0, -1e30).astype(jnp.float32)

    out = _mm_fused_call(
        x, y,
        params["q_w"], params["q_b"], params["q_dw_w"], params["q_dw_b"],
        params["kv_w"], params["kv_b"], params["kv_dw_w"], params["kv_dw_b"],
        temp_col, attn_bias, params["proj_w"], params["proj_b"], h, w)
    return out.reshape(b, c, h, w)


# ----------------------------------------------------------------------------
# Pure-JAX (XLA, f32) reference of the torch module, for in-script checks.
# ----------------------------------------------------------------------------
def mm_reference(params, x, y, num_head):
    b, c, h, w = x.shape
    prec = jax.lax.Precision.HIGHEST

    def conv1x1(t, w_, b_):
        out = jnp.einsum("oi,bihw->bohw", w_, t, precision=prec)
        return out + b_.reshape(1, -1, 1, 1)

    def dwconv3x3(t, w9, b_):
        C = t.shape[1]
        wt = jnp.transpose(w9[:, :, 0], (1, 0)).reshape(C, 1, 3, 3)
        out = jax.lax.conv_general_dilated(
            t, wt, window_strides=(1, 1), padding=((1, 1), (1, 1)),
            dimension_numbers=("NCHW", "OIHW", "NCHW"),
            feature_group_count=C, precision=prec)
        return out + b_.reshape(1, -1, 1, 1)

    q = dwconv3x3(conv1x1(x, params["q_w"], params["q_b"]),
                  params["q_dw_w"], params["q_dw_b"])
    kv = dwconv3x3(conv1x1(y, params["kv_w"], params["kv_b"]),
                   params["kv_dw_w"], params["kv_dw_b"])
    k, v = kv[:, :c], kv[:, c:]

    def heads(t):
        return t.reshape(b, num_head, c // num_head, h * w)

    def l2norm(t):
        n = jnp.sqrt(jnp.sum(t * t, axis=-1, keepdims=True))
        return t / jnp.maximum(n, 1e-12)

    qh, kh, vh = l2norm(heads(q)), l2norm(heads(k)), heads(v)
    attn = jnp.einsum("bhcs,bhds->bhcd", qh, kh, precision=prec)
    attn = attn * params["temperature"].reshape(1, num_head, 1, 1)
    attn = jax.nn.softmax(attn, axis=-1)
    out = jnp.einsum("bhcd,bhds->bhcs", attn, vh, precision=prec)
    out = out.reshape(b, c, h, w)
    return conv1x1(out, params["proj_w"], params["proj_b"])


if __name__ == "__main__":
    dim, num_head = 8, 2
    b, h, w = 2, 16, 16

    key = jax.random.PRNGKey(0)
    kx, ky, kp = jax.random.split(key, 3)
    x = jax.random.normal(kx, (b, dim, h, w), jnp.float32)
    y = jax.random.normal(ky, (b, dim, h, w), jnp.float32)
    params = init_params(kp, dim, num_head)

    fwd = jax.jit(functools.partial(mm_forward, num_head=num_head))
    out = fwd(params, x, y)
    jax.block_until_ready(out)

    assert out.shape == (b, dim, h, w)
    assert bool(jnp.all(jnp.isfinite(out)))

    # Kernel uses bf16 MXU operands (f32 accumulation), reference is pure f32,
    # so allow a bf16-sized tolerance; structural errors would be >> this.
    ref = mm_reference(params, x, y, num_head)
    err = float(jnp.max(jnp.abs(out - ref)) / (jnp.max(jnp.abs(ref)) + 1e-8))
    assert err < 3e-2, f"kernel/reference mismatch: normalized max err = {err}"
    print("KERNEL_OK")
</pallas_src>

<mosaic_0001>
module attributes {stable_mosaic.version = 11 : i64} {
  func.func @_mm_fused_kernel(%arg0: i32, %arg1: memref<1x8x256xf32, #tpu.memory_space<vmem>>, %arg2: memref<1x8x256xf32, #tpu.memory_space<vmem>>, %arg3: memref<8x8xf32, #tpu.memory_space<vmem>>, %arg4: memref<8x1xf32, #tpu.memory_space<vmem>>, %arg5: memref<9x8x1xf32, #tpu.memory_space<vmem>>, %arg6: memref<8x1xf32, #tpu.memory_space<vmem>>, %arg7: memref<16x8xf32, #tpu.memory_space<vmem>>, %arg8: memref<16x1xf32, #tpu.memory_space<vmem>>, %arg9: memref<9x16x1xf32, #tpu.memory_space<vmem>>, %arg10: memref<16x1xf32, #tpu.memory_space<vmem>>, %arg11: memref<8x1xf32, #tpu.memory_space<vmem>>, %arg12: memref<8x8xf32, #tpu.memory_space<vmem>>, %arg13: memref<8x8xf32, #tpu.memory_space<vmem>>, %arg14: memref<8x1xf32, #tpu.memory_space<vmem>>, %arg15: memref<1x8x256xf32, #tpu.memory_space<vmem>>, %arg16: memref<8x290xf32, #tpu.memory_space<vmem>>, %arg17: memref<16x290xf32, #tpu.memory_space<vmem>>) attributes {dimension_semantics = [#tpu.dimension_semantics<parallel>], iteration_bounds = array<i64: 2>, scalar_prefetch = 0 : i64, scratch_operands = 2 : i64, tpu.core_type = #tpu.core_type<tc>, window_params = [{transform_indices = @transform_0, window_bounds = array<i64: 1, 8, 256>}, {transform_indices = @transform_1, window_bounds = array<i64: 1, 8, 256>}, {pipeline_mode = #tpu.pipeline_mode<synchronous>, transform_indices = @transform_2, window_bounds = array<i64: 8, 8>}, {pipeline_mode = #tpu.pipeline_mode<synchronous>, transform_indices = @transform_3, window_bounds = array<i64: 8, 1>}, {pipeline_mode = #tpu.pipeline_mode<synchronous>, transform_indices = @transform_4, window_bounds = array<i64: 9, 8, 1>}, {pipeline_mode = #tpu.pipeline_mode<synchronous>, transform_indices = @transform_5, window_bounds = array<i64: 8, 1>}, {pipeline_mode = #tpu.pipeline_mode<synchronous>, transform_indices = @transform_6, window_bounds = array<i64: 16, 8>}, {pipeline_mode = #tpu.pipeline_mode<synchronous>, transform_indices = @transform_7, window_bounds = array<i64: 16, 1>}, {pipeline_mode = #tpu.pipeline_mode<synchronous>, transform_indices = @transform_8, window_bounds = array<i64: 9, 16, 1>}, {pipeline_mode = #tpu.pipeline_mode<synchronous>, transform_indices = @transform_9, window_bounds = array<i64: 16, 1>}, {pipeline_mode = #tpu.pipeline_mode<synchronous>, transform_indices = @transform_10, window_bounds = array<i64: 8, 1>}, {pipeline_mode = #tpu.pipeline_mode<synchronous>, transform_indices = @transform_11, window_bounds = array<i64: 8, 8>}, {pipeline_mode = #tpu.pipeline_mode<synchronous>, transform_indices = @transform_12, window_bounds = array<i64: 8, 8>}, {pipeline_mode = #tpu.pipeline_mode<synchronous>, transform_indices = @transform_13, window_bounds = array<i64: 8, 1>}, {transform_indices = @transform_14, window_bounds = array<i64: 1, 8, 256>}]} {
    %c0 = arith.constant 0 : index
    %c0_0 = arith.constant 0 : index
    %c0_1 = arith.constant 0 : index
    %0 = vector.load %arg1[%c0, %c0_0, %c0_1] : memref<1x8x256xf32, #tpu.memory_space<vmem>>, vector<1x8x256xf32>
    %1 = vector.shape_cast %0 : vector<1x8x256xf32> to vector<8x256xf32>
    %c0_2 = arith.constant 0 : index
    %c0_3 = arith.constant 0 : index
    %2 = vector.load %arg3[%c0_2, %c0_3] : memref<8x8xf32, #tpu.memory_space<vmem>>, vector<8x8xf32>
    %3 = arith.truncf %2 : vector<8x8xf32> to vector<8x8xbf16>
    %4 = arith.truncf %1 : vector<8x256xf32> to vector<8x256xbf16>
    %cst = arith.constant dense<0.000000e+00> : vector<8x256xf32>
    %5 = tpu.matmul %3, %4, %cst {dimension_numbers = #tpu.dot_dimension_numbers<[1], [0], [0], [1], [0, 0, 1, 1], [], []>} : vector<8x8xbf16>, vector<8x256xbf16>, vector<8x256xf32> -> vector<8x256xf32>
    %c0_4 = arith.constant 0 : index
    %c0_5 = arith.constant 0 : index
    %6 = vector.load %arg4[%c0_4, %c0_5] : memref<8x1xf32, #tpu.memory_space<vmem>>, vector<8x1xf32>
    %7 = vector.broadcast %6 : vector<8x1xf32> to vector<8x256xf32>
    %8 = arith.addf %5, %7 : vector<8x256xf32>
    %cst_6 = arith.constant 0.000000e+00 : f32
    %9 = vector.broadcast %cst_6 : f32 to vector<8x17xf32>
    %c0_7 = arith.constant 0 : index
    %c0_8 = arith.constant 0 : index
    %10 = vector.load %arg16[%c0_7, %c0_8] : memref<8x290xf32, #tpu.memory_space<vmem>>, vector<8x17xf32>
    tpu.vector_store %arg16[%c0_7, %c0_8], %9 {strides = array<i32>} : memref<8x290xf32, #tpu.memory_space<vmem>>, vector<8x17xf32>,
    %cst_9 = arith.constant 0.000000e+00 : f32
    %11 = vector.broadcast %cst_9 : f32 to vector<8x17xf32>
    %c0_10 = arith.constant 0 : index
    %c273 = arith.constant 273 : index
    %12 = vector.load %arg16[%c0_10, %c273] : memref<8x290xf32, #tpu.memory_space<vmem>>, vector<8x17xf32>
    tpu.vector_store %arg16[%c0_10, %c273], %11 {strides = array<i32>} : memref<8x290xf32, #tpu.memory_space<vmem>>, vector<8x17xf32>,
    %c0_11 = arith.constant 0 : index
    %c17 = arith.constant 17 : index
    %13 = vector.load %arg16[%c0_11, %c17] : memref<8x290xf32, #tpu.memory_space<vmem>>, vector<8x256xf32>
    tpu.vector_store %arg16[%c0_11, %c17], %8 {strides = array<i32>} : memref<8x290xf32, #tpu.memory_space<vmem>>, vector<8x256xf32>,
    %14 = tpu.iota {dimensions = array<i32: 1>} : vector<8x256xi32>
    %c15_i32 = arith.constant 15 : i32
    %15 = vector.broadcast %c15_i32 : i32 to vector<8x256xi32>
    %16 = arith.andi %14, %15 : vector<8x256xi32>
    %c1_i32 = arith.constant 1 : i32
    %17 = vector.broadcast %c1_i32 : i32 to vector<8x256xi32>
    %18 = arith.cmpi sge, %16, %17 : vector<8x256xi32>
    %c14_i32 = arith.constant 14 : i32
    %19 = vector.broadcast %c14_i32 : i32 to vector<8x256xi32>
    %20 = arith.cmpi sle, %16, %19 : vector<8x256xi32>
    %c0_12 = arith.constant 0 : index
    %c0_13 = arith.constant 0 : index
    %c0_14 = arith.constant 0 : index
    %21 = vector.load %arg5[%c0_12, %c0_13, %c0_14] : memref<9x8x1xf32, #tpu.memory_space<vmem>>, vector<9x8x1xf32>
    %cst_15 = arith.constant 0.000000e+00 : f32
    %22 = vector.broadcast %cst_15 : f32 to vector<8x256xf32>
    %c0_16 = arith.constant 0 : index
    %c0_17 = arith.constant 0 : index
    %23 = vector.load %arg16[%c0_16, %c0_17] : memref<8x290xf32, #tpu.memory_space<vmem>>, vector<8x256xf32>
    %cst_18 = arith.constant 0.000000e+00 : f32
    %24 = vector.broadcast %cst_18 : f32 to vector<8x256xf32>
    %25 = arith.select %18, %23, %24 : vector<8x256xi1>, vector<8x256xf32>
    %26 = vector.extract_strided_slice %21 {offsets = [0, 0, 0], sizes = [1, 8, 1], strides = [1, 1, 1]} : vector<9x8x1xf32> to vector<1x8x1xf32>
    %27 = vector.shape_cast %26 : vector<1x8x1xf32> to vector<8x1xf32>
    %28 = vector.broadcast %27 : vector<8x1xf32> to vector<8x256xf32>
    %29 = arith.mulf %25, %28 : vector<8x256xf32>
    %30 = arith.addf %22, %29 : vector<8x256xf32>
    %c0_19 = arith.constant 0 : index
    %c1 = arith.constant 1 : index
    %31 = vector.load %arg16[%c0_19, %c1] : memref<8x290xf32, #tpu.memory_space<vmem>>, vector<8x256xf32>
    %32 = vector.extract_strided_slice %21 {offsets = [1, 0, 0], sizes = [1, 8, 1], strides = [1, 1, 1]} : vector<9x8x1xf32> to vector<1x8x1xf32>
    %33 = vector.shape_cast %32 : vector<1x8x1xf32> to vector<8x1xf32>
    %34 = vector.broadcast %33 : vector<8x1xf32> to vector<8x256xf32>
    %35 = arith.mulf %31, %34 : vector<8x256xf32>
    %36 = arith.addf %30, %35 : vector<8x256xf32>
    %c0_20 = arith.constant 0 : index
    %c2 = arith.constant 2 : index
    %37 = vector.load %arg16[%c0_20, %c2] : memref<8x290xf32, #tpu.memory_space<vmem>>, vector<8x256xf32>
    %cst_21 = arith.constant 0.000000e+00 : f32
    %38 = vector.broadcast %cst_21 : f32 to vector<8x256xf32>
    %39 = arith.select %20, %37, %38 : vector<8x256xi1>, vector<8x256xf32>
    %40 = vector.extract_strided_slice %21 {offsets = [2, 0, 0], sizes = [1, 8, 1], strides = [1, 1, 1]} : vector<9x8x1xf32> to vector<1x8x1xf32>
    %41 = vector.shape_cast %40 : vector<1x8x1xf32> to vector<8x1xf32>
    %42 = vector.broadcast %41 : vector<8x1xf32> to vector<8x256xf32>
    %43 = arith.mulf %39, %42 : vector<8x256xf32>
    %44 = arith.addf %36, %43 : vector<8x256xf32>
    %c0_22 = arith.constant 0 : index
    %c16 = arith.constant 16 : index
    %45 = vector.load %arg16[%c0_22, %c16] : memref<8x290xf32, #tpu.memory_space<vmem>>, vector<8x256xf32>
    %cst_23 = arith.constant 0.000000e+00 : f32
    %46 = vector.broadcast %cst_23 : f32 to vector<8x256xf32>
    %47 = arith.select %18, %45, %46 : vector<8x256xi1>, vector<8x256xf32>
    %48 = vector.extract_strided_slice %21 {offsets = [3, 0, 0], sizes = [1, 8, 1], strides = [1, 1, 1]} : vector<9x8x1xf32> to vector<1x8x1xf32>
    %49 = vector.shape_cast %48 : vector<1x8x1xf32> to vector<8x1xf32>
    %50 = vector.broadcast %49 : vector<8x1xf32> to vector<8x256xf32>
    %51 = arith.mulf %47, %50 : vector<8x256xf32>
    %52 = arith.addf %44, %51 : vector<8x256xf32>
    %c0_24 = arith.constant 0 : index
    %c17_25 = arith.constant 17 : index
    %53 = vector.load %arg16[%c0_24, %c17_25] : memref<8x290xf32, #tpu.memory_space<vmem>>, vector<8x256xf32>
    %54 = vector.extract_strided_slice %21 {offsets = [4, 0, 0], sizes = [1, 8, 1], strides = [1, 1, 1]} : vector<9x8x1xf32> to vector<1x8x1xf32>
    %55 = vector.shape_cast %54 : vector<1x8x1xf32> to vector<8x1xf32>
    %56 = vector.broadcast %55 : vector<8x1xf32> to vector<8x256xf32>
    %57 = arith.mulf %53, %56 : vector<8x256xf32>
    %58 = arith.addf %52, %57 : vector<8x256xf32>
    %c0_26 = arith.constant 0 : index
    %c18 = arith.constant 18 : index
    %59 = vector.load %arg16[%c0_26, %c18] : memref<8x290xf32, #tpu.memory_space<vmem>>, vector<8x256xf32>
    %cst_27 = arith.constant 0.000000e+00 : f32
    %60 = vector.broadcast %cst_27 : f32 to vector<8x256xf32>
    %61 = arith.select %20, %59, %60 : vector<8x256xi1>, vector<8x256xf32>
    %62 = vector.extract_strided_slice %21 {offsets = [5, 0, 0], sizes = [1, 8, 1], strides = [1, 1, 1]} : vector<9x8x1xf32> to vector<1x8x1xf32>
    %63 = vector.shape_cast %62 : vector<1x8x1xf32> to vector<8x1xf32>
    %64 = vector.broadcast %63 : vector<8x1xf32> to vector<8x256xf32>
    %65 = arith.mulf %61, %64 : vector<8x256xf32>
    %66 = arith.addf %58, %65 : vector<8x256xf32>
    %c0_28 = arith.constant 0 : index
    %c32 = arith.constant 32 : index
    %67 = vector.load %arg16[%c0_28, %c32] : memref<8x290xf32, #tpu.memory_space<vmem>>, vector<8x256xf32>
    %cst_29 = arith.constant 0.000000e+00 : f32
    %68 = vector.broadcast %cst_29 : f32 to vector<8x256xf32>
    %69 = arith.select %18, %67, %68 : vector<8x256xi1>, vector<8x256xf32>
    %70 = vector.extract_strided_slice %21 {offsets = [6, 0, 0], sizes = [1, 8, 1], strides = [1, 1, 1]} : vector<9x8x1xf32> to vector<1x8x1xf32>
    %71 = vector.shape_cast %70 : vector<1x8x1xf32> to vector<8x1xf32>
    %72 = vector.broadcast %71 : vector<8x1xf32> to vector<8x256xf32>
    %73 = arith.mulf %69, %72 : vector<8x256xf32>
    %74 = arith.addf %66, %73 : vector<8x256xf32>
    %c0_30 = arith.constant 0 : index
    %c33 = arith.constant 33 : index
    %75 = vector.load %arg16[%c0_30, %c33] : memref<8x290xf32, #tpu.memory_space<vmem>>, vector<8x256xf32>
    %76 = vector.extract_strided_slice %21 {offsets = [7, 0, 0], sizes = [1, 8, 1], strides = [1, 1, 1]} : vector<9x8x1xf32> to vector<1x8x1xf32>
    %77 = vector.shape_cast %76 : vector<1x8x1xf32> to vector<8x1xf32>
    %78 = vector.broadcast %77 : vector<8x1xf32> to vector<8x256xf32>
    %79 = arith.mulf %75, %78 : vector<8x256xf32>
    %80 = arith.addf %74, %79 : vector<8x256xf32>
    %c0_31 = arith.constant 0 : index
    %c34 = arith.constant 34 : index
    %81 = vector.load %arg16[%c0_31, %c34] : memref<8x290xf32, #tpu.memory_space<vmem>>, vector<8x256xf32>
    %cst_32 = arith.constant 0.000000e+00 : f32
    %82 = vector.broadcast %cst_32 : f32 to vector<8x256xf32>
    %83 = arith.select %20, %81, %82 : vector<8x256xi1>, vector<8x256xf32>
    %84 = vector.extract_strided_slice %21 {offsets = [8, 0, 0], sizes = [1, 8, 1], strides = [1, 1, 1]} : vector<9x8x1xf32> to vector<1x8x1xf32>
    %85 = vector.shape_cast %84 : vector<1x8x1xf32> to vector<8x1xf32>
    %86 = vector.broadcast %85 : vector<8x1xf32> to vector<8x256xf32>
    %87 = arith.mulf %83, %86 : vector<8x256xf32>
    %88 = arith.addf %80, %87 : vector<8x256xf32>
    %c0_33 = arith.constant 0 : index
    %c0_34 = arith.constant 0 : index
    %89 = vector.load %arg6[%c0_33, %c0_34] : memref<8x1xf32, #tpu.memory_space<vmem>>, vector<8x1xf32>
    %90 = vector.broadcast %89 : vector<8x1xf32> to vector<8x256xf32>
    %91 = arith.addf %88, %90 : vector<8x256xf32>
    %c0_35 = arith.constant 0 : index
    %c0_36 = arith.constant 0 : index
    %c0_37 = arith.constant 0 : index
    %92 = vector.load %arg2[%c0_35, %c0_36, %c0_37] : memref<1x8x256xf32, #tpu.memory_space<vmem>>, vector<1x8x256xf32>
    %93 = vector.shape_cast %92 : vector<1x8x256xf32> to vector<8x256xf32>
    %c0_38 = arith.constant 0 : index
    %c0_39 = arith.constant 0 : index
    %94 = vector.load %arg7[%c0_38, %c0_39] : memref<16x8xf32, #tpu.memory_space<vmem>>, vector<16x8xf32>
    %95 = arith.truncf %94 : vector<16x8xf32> to vector<16x8xbf16>
    %96 = arith.truncf %93 : vector<8x256xf32> to vector<8x256xbf16>
    %cst_40 = arith.constant dense<0.000000e+00> : vector<16x256xf32>
    %97 = tpu.matmul %95, %96, %cst_40 {dimension_numbers = #tpu.dot_dimension_numbers<[1], [0], [0], [1], [0, 0, 1, 1], [], []>} : vector<16x8xbf16>, vector<8x256xbf16>, vector<16x256xf32> -> vector<16x256xf32>
    %c0_41 = arith.constant 0 : index
    %c0_42 = arith.constant 0 : index
    %98 = vector.load %arg8[%c0_41, %c0_42] : memref<16x1xf32, #tpu.memory_space<vmem>>, vector<16x1xf32>
    %99 = vector.broadcast %98 : vector<16x1xf32> to vector<16x256xf32>
    %100 = arith.addf %97, %99 : vector<16x256xf32>
    %cst_43 = arith.constant 0.000000e+00 : f32
    %101 = vector.broadcast %cst_43 : f32 to vector<16x17xf32>
    %c0_44 = arith.constant 0 : index
    %c0_45 = arith.constant 0 : index
    %102 = vector.load %arg17[%c0_44, %c0_45] : memref<16x290xf32, #tpu.memory_space<vmem>>, vector<16x17xf32>
    tpu.vector_store %arg17[%c0_44, %c0_45], %101 {strides = array<i32>} : memref<16x290xf32, #tpu.memory_space<vmem>>, vector<16x17xf32>,
    %cst_46 = arith.constant 0.000000e+00 : f32
    %103 = vector.broadcast %cst_46 : f32 to vector<16x17xf32>
    %c0_47 = arith.constant 0 : index
    %c273_48 = arith.constant 273 : index
    %104 = vector.load %arg17[%c0_47, %c273_48] : memref<16x290xf32, #tpu.memory_space<vmem>>, vector<16x17xf32>
    tpu.vector_store %arg17[%c0_47, %c273_48], %103 {strides = array<i32>} : memref<16x290xf32, #tpu.memory_space<vmem>>, vector<16x17xf32>,
    %c0_49 = arith.constant 0 : index
    %c17_50 = arith.constant 17 : index
    %105 = vector.load %arg17[%c0_49, %c17_50] : memref<16x290xf32, #tpu.memory_space<vmem>>, vector<16x256xf32>
    tpu.vector_store %arg17[%c0_49, %c17_50], %100 {strides = array<i32>} : memref<16x290xf32, #tpu.memory_space<vmem>>, vector<16x256xf32>,
    %106 = tpu.iota {dimensions = array<i32: 1>} : vector<16x256xi32>
    %c15_i32_51 = arith.constant 15 : i32
    %107 = vector.broadcast %c15_i32_51 : i32 to vector<16x256xi32>
    %108 = arith.andi %106, %107 : vector<16x256xi32>
    %c1_i32_52 = arith.constant 1 : i32
    %109 = vector.broadcast %c1_i32_52 : i32 to vector<16x256xi32>
    %110 = arith.cmpi sge, %108, %109 : vector<16x256xi32>
    %c14_i32_53 = arith.constant 14 : i32
    %111 = vector.broadcast %c14_i32_53 : i32 to vector<16x256xi32>
    %112 = arith.cmpi sle, %108, %111 : vector<16x256xi32>
    %c0_54 = arith.constant 0 : index
    %c0_55 = arith.constant 0 : index
    %c0_56 = arith.constant 0 : index
    %113 = vector.load %arg9[%c0_54, %c0_55, %c0_56] : memref<9x16x1xf32, #tpu.memory_space<vmem>>, vector<9x16x1xf32>
    %cst_57 = arith.constant 0.000000e+00 : f32
    %114 = vector.broadcast %cst_57 : f32 to vector<16x256xf32>
    %c0_58 = arith.constant 0 : index
    %c0_59 = arith.constant 0 : index
    %115 = vector.load %arg17[%c0_58, %c0_59] : memref<16x290xf32, #tpu.memory_space<vmem>>, vector<16x256xf32>
    %cst_60 = arith.constant 0.000000e+00 : f32
    %116 = vector.broadcast %cst_60 : f32 to vector<16x256xf32>
    %117 = arith.select %110, %115, %116 : vector<16x256xi1>, vector<16x256xf32>
    %118 = vector.extract_strided_slice %113 {offsets = [0, 0, 0], sizes = [1, 16, 1], strides = [1, 1, 1]} : vector<9x16x1xf32> to vector<1x16x1xf32>
    %119 = vector.shape_cast %118 : vector<1x16x1xf32> to vector<16x1xf32>
    %120 = vector.broadcast %119 : vector<16x1xf32> to vector<16x256xf32>
    %121 = arith.mulf %117, %120 : vector<16x256xf32>
    %122 = arith.addf %114, %121 : vector<16x256xf32>
    %c0_61 = arith.constant 0 : index
    %c1_62 = arith.constant 1 : index
    %123 = vector.load %arg17[%c0_61, %c1_62] : memref<16x290xf32, #tpu.memory_space<vmem>>, vector<16x256xf32>
    %124 = vector.extract_strided_slice %113 {offsets = [1, 0, 0], sizes = [1, 16, 1], strides = [1, 1, 1]} : vector<9x16x1xf32> to vector<1x16x1xf32>
    %125 = vector.shape_cast %124 : vector<1x16x1xf32> to vector<16x1xf32>
    %126 = vector.broadcast %125 : vector<16x1xf32> to vector<16x256xf32>
    %127 = arith.mulf %123, %126 : vector<16x256xf32>
    %128 = arith.addf %122, %127 : vector<16x256xf32>
    %c0_63 = arith.constant 0 : index
    %c2_64 = arith.constant 2 : index
    %129 = vector.load %arg17[%c0_63, %c2_64] : memref<16x290xf32, #tpu.memory_space<vmem>>, vector<16x256xf32>
    %cst_65 = arith.constant 0.000000e+00 : f32
    %130 = vector.broadcast %cst_65 : f32 to vector<16x256xf32>
    %131 = arith.select %112, %129, %130 : vector<16x256xi1>, vector<16x256xf32>
    %132 = vector.extract_strided_slice %113 {offsets = [2, 0, 0], sizes = [1, 16, 1], strides = [1, 1, 1]} : vector<9x16x1xf32> to vector<1x16x1xf32>
    %133 = vector.shape_cast %132 : vector<1x16x1xf32> to vector<16x1xf32>
    %134 = vector.broadcast %133 : vector<16x1xf32> to vector<16x256xf32>
    %135 = arith.mulf %131, %134 : vector<16x256xf32>
    %136 = arith.addf %128, %135 : vector<16x256xf32>
    %c0_66 = arith.constant 0 : index
    %c16_67 = arith.constant 16 : index
    %137 = vector.load %arg17[%c0_66, %c16_67] : memref<16x290xf32, #tpu.memory_space<vmem>>, vector<16x256xf32>
    %cst_68 = arith.constant 0.000000e+00 : f32
    %138 = vector.broadcast %cst_68 : f32 to vector<16x256xf32>
    %139 = arith.select %110, %137, %138 : vector<16x256xi1>, vector<16x256xf32>
    %140 = vector.extract_strided_slice %113 {offsets = [3, 0, 0], sizes = [1, 16, 1], strides = [1, 1, 1]} : vector<9x16x1xf32> to vector<1x16x1xf32>
    %141 = vector.shape_cast %140 : vector<1x16x1xf32> to vector<16x1xf32>
    %142 = vector.broadcast %141 : vector<16x1xf32> to vector<16x256xf32>
    %143 = arith.mulf %139, %142 : vector<16x256xf32>
    %144 = arith.addf %136, %143 : vector<16x256xf32>
    %c0_69 = arith.constant 0 : index
    %c17_70 = arith.constant 17 : index
    %145 = vector.load %arg17[%c0_69, %c17_70] : memref<16x290xf32, #tpu.memory_space<vmem>>, vector<16x256xf32>
    %146 = vector.extract_strided_slice %113 {offsets = [4, 0, 0], sizes = [1, 16, 1], strides = [1, 1, 1]} : vector<9x16x1xf32> to vector<1x16x1xf32>
    %147 = vector.shape_cast %146 : vector<1x16x1xf32> to vector<16x1xf32>
    %148 = vector.broadcast %147 : vector<16x1xf32> to vector<16x256xf32>
    %149 = arith.mulf %145, %148 : vector<16x256xf32>
    %150 = arith.addf %144, %149 : vector<16x256xf32>
    %c0_71 = arith.constant 0 : index
    %c18_72 = arith.constant 18 : index
    %151 = vector.load %arg17[%c0_71, %c18_72] : memref<16x290xf32, #tpu.memory_space<vmem>>, vector<16x256xf32>
    %cst_73 = arith.constant 0.000000e+00 : f32
    %152 = vector.broadcast %cst_73 : f32 to vector<16x256xf32>
    %153 = arith.select %112, %151, %152 : vector<16x256xi1>, vector<16x256xf32>
    %154 = vector.extract_strided_slice %113 {offsets = [5, 0, 0], sizes = [1, 16, 1], strides = [1, 1, 1]} : vector<9x16x1xf32> to vector<1x16x1xf32>
    %155 = vector.shape_cast %154 : vector<1x16x1xf32> to vector<16x1xf32>
    %156 = vector.broadcast %155 : vector<16x1xf32> to vector<16x256xf32>
    %157 = arith.mulf %153, %156 : vector<16x256xf32>
    %158 = arith.addf %150, %157 : vector<16x256xf32>
    %c0_74 = arith.constant 0 : index
    %c32_75 = arith.constant 32 : index
    %159 = vector.load %arg17[%c0_74, %c32_75] : memref<16x290xf32, #tpu.memory_space<vmem>>, vector<16x256xf32>
    %cst_76 = arith.constant 0.000000e+00 : f32
    %160 = vector.broadcast %cst_76 : f32 to vector<16x256xf32>
    %161 = arith.select %110, %159, %160 : vector<16x256xi1>, vector<16x256xf32>
    %162 = vector.extract_strided_slice %113 {offsets = [6, 0, 0], sizes = [1, 16, 1], strides = [1, 1, 1]} : vector<9x16x1xf32> to vector<1x16x1xf32>
    %163 = vector.shape_cast %162 : vector<1x16x1xf32> to vector<16x1xf32>
    %164 = vector.broadcast %163 : vector<16x1xf32> to vector<16x256xf32>
    %165 = arith.mulf %161, %164 : vector<16x256xf32>
    %166 = arith.addf %158, %165 : vector<16x256xf32>
    %c0_77 = arith.constant 0 : index
    %c33_78 = arith.constant 33 : index
    %167 = vector.load %arg17[%c0_77, %c33_78] : memref<16x290xf32, #tpu.memory_space<vmem>>, vector<16x256xf32>
    %168 = vector.extract_strided_slice %113 {offsets = [7, 0, 0], sizes = [1, 16, 1], strides = [1, 1, 1]} : vector<9x16x1xf32> to vector<1x16x1xf32>
    %169 = vector.shape_cast %168 : vector<1x16x1xf32> to vector<16x1xf32>
    %170 = vector.broadcast %169 : vector<16x1xf32> to vector<16x256xf32>
    %171 = arith.mulf %167, %170 : vector<16x256xf32>
    %172 = arith.addf %166, %171 : vector<16x256xf32>
    %c0_79 = arith.constant 0 : index
    %c34_80 = arith.constant 34 : index
    %173 = vector.load %arg17[%c0_79, %c34_80] : memref<16x290xf32, #tpu.memory_space<vmem>>, vector<16x256xf32>
    %cst_81 = arith.constant 0.000000e+00 : f32
    %174 = vector.broadcast %cst_81 : f32 to vector<16x256xf32>
    %175 = arith.select %112, %173, %174 : vector<16x256xi1>, vector<16x256xf32>
    %176 = vector.extract_strided_slice %113 {offsets = [8, 0, 0], sizes = [1, 16, 1], strides = [1, 1, 1]} : vector<9x16x1xf32> to vector<1x16x1xf32>
    %177 = vector.shape_cast %176 : vector<1x16x1xf32> to vector<16x1xf32>
    %178 = vector.broadcast %177 : vector<16x1xf32> to vector<16x256xf32>
    %179 = arith.mulf %175, %178 : vector<16x256xf32>
    %180 = arith.addf %172, %179 : vector<16x256xf32>
    %c0_82 = arith.constant 0 : index
    %c0_83 = arith.constant 0 : index
    %181 = vector.load %arg10[%c0_82, %c0_83] : memref<16x1xf32, #tpu.memory_space<vmem>>, vector<16x1xf32>
    %182 = vector.broadcast %181 : vector<16x1xf32> to vector<16x256xf32>
    %183 = arith.addf %180, %182 : vector<16x256xf32>
    %184 = vector.extract_strided_slice %183 {offsets = [0, 0], sizes = [8, 256], strides = [1, 1]} : vector<16x256xf32> to vector<8x256xf32>
    %185 = vector.extract_strided_slice %183 {offsets = [8, 0], sizes = [8, 256], strides = [1, 1]} : vector<16x256xf32> to vector<8x256xf32>
    %186 = arith.mulf %91, %91 : vector<8x256xf32>
    %cst_84 = arith.constant dense<0.000000e+00> : vector<8xf32>
    %187 = vector.multi_reduction <add>, %186, %cst_84 [1] : vector<8x256xf32> to vector<8xf32>
    %188 = vector.shape_cast %187 : vector<8xf32> to vector<8x1xf32>
    %cst_85 = arith.constant 1.000000e-24 : f32
    %189 = vector.broadcast %cst_85 : f32 to vector<8x1xf32>
    %190 = arith.maximumf %188, %189 : vector<8x1xf32>
    %191 = math.rsqrt %190 : vector<8x1xf32>
    %192 = vector.broadcast %191 : vector<8x1xf32> to vector<8x256xf32>
    %193 = arith.mulf %91, %192 : vector<8x256xf32>
    %194 = arith.mulf %184, %184 : vector<8x256xf32>
    %cst_86 = arith.constant dense<0.000000e+00> : vector<8xf32>
    %195 = vector.multi_reduction <add>, %194, %cst_86 [1] : vector<8x256xf32> to vector<8xf32>
    %196 = vector.shape_cast %195 : vector<8xf32> to vector<8x1xf32>
    %cst_87 = arith.constant 1.000000e-24 : f32
    %197 = vector.broadcast %cst_87 : f32 to vector<8x1xf32>
    %198 = arith.maximumf %196, %197 : vector<8x1xf32>
    %199 = math.rsqrt %198 : vector<8x1xf32>
    %200 = vector.broadcast %199 : vector<8x1xf32> to vector<8x256xf32>
    %201 = arith.mulf %184, %200 : vector<8x256xf32>
    %202 = arith.truncf %193 : vector<8x256xf32> to vector<8x256xbf16>
    %203 = arith.truncf %201 : vector<8x256xf32> to vector<8x256xbf16>
    %cst_88 = arith.constant dense<0.000000e+00> : vector<8x8xf32>
    %204 = tpu.matmul %202, %203, %cst_88 {dimension_numbers = #tpu.dot_dimension_numbers<[1], [1], [0], [0], [0, 0, 1, 0], [], []>} : vector<8x256xbf16>, vector<8x256xbf16>, vector<8x8xf32> -> vector<8x8xf32>
    %c0_89 = arith.constant 0 : index
    %c0_90 = arith.constant 0 : index
    %205 = vector.load %arg11[%c0_89, %c0_90] : memref<8x1xf32, #tpu.memory_space<vmem>>, vector<8x1xf32>
    %206 = vector.broadcast %205 : vector<8x1xf32> to vector<8x8xf32>
    %207 = arith.mulf %204, %206 : vector<8x8xf32>
    %c0_91 = arith.constant 0 : index
    %c0_92 = arith.constant 0 : index
    %208 = vector.load %arg12[%c0_91, %c0_92] : memref<8x8xf32, #tpu.memory_space<vmem>>, vector<8x8xf32>
    %209 = arith.addf %207, %208 : vector<8x8xf32>
    %cst_93 = arith.constant dense<0xFF800000> : vector<8xf32>
    %210 = vector.multi_reduction <maximumf>, %209, %cst_93 [1] : vector<8x8xf32> to vector<8xf32>
    %211 = vector.shape_cast %210 : vector<8xf32> to vector<8x1xf32>
    %212 = vector.broadcast %211 : vector<8x1xf32> to vector<8x8xf32>
    %213 = arith.subf %209, %212 : vector<8x8xf32>
    %214 = math.exp %213 : vector<8x8xf32>
    %cst_94 = arith.constant dense<0.000000e+00> : vector<8xf32>
    %215 = vector.multi_reduction <add>, %214, %cst_94 [1] : vector<8x8xf32> to vector<8xf32>
    %216 = vector.shape_cast %215 : vector<8xf32> to vector<8x1xf32>
    %217 = tpu.reciprocal %216 {approx = true} : vector<8x1xf32> -> vector<8x1xf32>
    %218 = vector.broadcast %217 : vector<8x1xf32> to vector<8x8xf32>
    %219 = arith.mulf %214, %218 : vector<8x8xf32>
    %220 = arith.truncf %219 : vector<8x8xf32> to vector<8x8xbf16>
    %221 = arith.truncf %185 : vector<8x256xf32> to vector<8x256xbf16>
    %cst_95 = arith.constant dense<0.000000e+00> : vector<8x256xf32>
    %222 = tpu.matmul %220, %221, %cst_95 {dimension_numbers = #tpu.dot_dimension_numbers<[1], [0], [0], [1], [0, 0, 1, 1], [], []>} : vector<8x8xbf16>, vector<8x256xbf16>, vector<8x256xf32> -> vector<8x256xf32>
    %c0_96 = arith.constant 0 : index
    %c0_97 = arith.constant 0 : index
    %223 = vector.load %arg13[%c0_96, %c0_97] : memref<8x8xf32, #tpu.memory_space<vmem>>, vector<8x8xf32>
    %224 = arith.truncf %223 : vector<8x8xf32> to vector<8x8xbf16>
    %225 = arith.truncf %222 : vector<8x256xf32> to vector<8x256xbf16>
    %cst_98 = arith.constant dense<0.000000e+00> : vector<8x256xf32>
    %226 = tpu.matmul %224, %225, %cst_98 {dimension_numbers = #tpu.dot_dimension_numbers<[1], [0], [0], [1], [0, 0, 1, 1], [], []>} : vector<8x8xbf16>, vector<8x256xbf16>, vector<8x256xf32> -> vector<8x256xf32>
    %c0_99 = arith.constant 0 : index
    %c0_100 = arith.constant 0 : index
    %227 = vector.load %arg14[%c0_99, %c0_100] : memref<8x1xf32, #tpu.memory_space<vmem>>, vector<8x1xf32>
    %228 = vector.broadcast %227 : vector<8x1xf32> to vector<8x256xf32>
    %229 = arith.addf %226, %228 : vector<8x256xf32>
    %c0_101 = arith.constant 0 : index
    %c0_102 = arith.constant 0 : index
    %c0_103 = arith.constant 0 : index
    %230 = vector.load %arg15[%c0_101, %c0_102, %c0_103] : memref<1x8x256xf32, #tpu.memory_space<vmem>>, vector<1x8x256xf32>
    %231 = vector.shape_cast %230 : vector<1x8x256xf32> to vector<8x256xf32>
    %232 = vector.shape_cast %229 : vector<8x256xf32> to vector<1x8x256xf32>
    tpu.vector_store %arg15[%c0_101, %c0_102, %c0_103], %232 {strides = array<i32>} : memref<1x8x256xf32, #tpu.memory_space<vmem>>, vector<1x8x256xf32>,
    return
  }
  func.func @transform_0(%arg0: i32) -> (i32, i32, i32) {
    %c0_i32 = arith.constant 0 : i32
    %c0_i32_0 = arith.constant 0 : i32
    %c0_i32_1 = arith.constant 0 : i32
    return %arg0, %c0_i32, %c0_i32_0 : i32, i32, i32
  }
  func.func @transform_1(%arg0: i32) -> (i32, i32, i32) {
    %c0_i32 = arith.constant 0 : i32
    %c0_i32_0 = arith.constant 0 : i32
    %c0_i32_1 = arith.constant 0 : i32
    return %arg0, %c0_i32, %c0_i32_0 : i32, i32, i32
  }
  func.func @transform_2(%arg0: i32) -> (i32, i32) {
    %c0_i32 = arith.constant 0 : i32
    %c0_i32_0 = arith.constant 0 : i32
    %c0_i32_1 = arith.constant 0 : i32
    return %c0_i32, %c0_i32_0 : i32, i32
  }
  func.func @transform_3(%arg0: i32) -> (i32, i32) {
    %c0_i32 = arith.constant 0 : i32
    %c0_i32_0 = arith.constant 0 : i32
    %c0_i32_1 = arith.constant 0 : i32
    return %c0_i32, %c0_i32_0 : i32, i32
  }
  func.func @transform_4(%arg0: i32) -> (i32, i32, i32) {
    %c0_i32 = arith.constant 0 : i32
    %c0_i32_0 = arith.constant 0 : i32
    %c0_i32_1 = arith.constant 0 : i32
    %c0_i32_2 = arith.constant 0 : i32
    return %c0_i32, %c0_i32_0, %c0_i32_1 : i32, i32, i32
  }
  func.func @transform_5(%arg0: i32) -> (i32, i32) {
    %c0_i32 = arith.constant 0 : i32
    %c0_i32_0 = arith.constant 0 : i32
    %c0_i32_1 = arith.constant 0 : i32
    return %c0_i32, %c0_i32_0 : i32, i32
  }
  func.func @transform_6(%arg0: i32) -> (i32, i32) {
    %c0_i32 = arith.constant 0 : i32
    %c0_i32_0 = arith.constant 0 : i32
    %c0_i32_1 = arith.constant 0 : i32
    return %c0_i32, %c0_i32_0 : i32, i32
  }
  func.func @transform_7(%arg0: i32) -> (i32, i32) {
    %c0_i32 = arith.constant 0 : i32
    %c0_i32_0 = arith.constant 0 : i32
    %c0_i32_1 = arith.constant 0 : i32
    return %c0_i32, %c0_i32_0 : i32, i32
  }
  func.func @transform_8(%arg0: i32) -> (i32, i32, i32) {
    %c0_i32 = arith.constant 0 : i32
    %c0_i32_0 = arith.constant 0 : i32
    %c0_i32_1 = arith.constant 0 : i32
    %c0_i32_2 = arith.constant 0 : i32
    return %c0_i32, %c0_i32_0, %c0_i32_1 : i32, i32, i32
  }
  func.func @transform_9(%arg0: i32) -> (i32, i32) {
    %c0_i32 = arith.constant 0 : i32
    %c0_i32_0 = arith.constant 0 : i32
    %c0_i32_1 = arith.constant 0 : i32
    return %c0_i32, %c0_i32_0 : i32, i32
  }
  func.func @transform_10(%arg0: i32) -> (i32, i32) {
    %c0_i32 = arith.constant 0 : i32
    %c0_i32_0 = arith.constant 0 : i32
    %c0_i32_1 = arith.constant 0 : i32
    return %c0_i32, %c0_i32_0 : i32, i32
  }
  func.func @transform_11(%arg0: i32) -> (i32, i32) {
    %c0_i32 = arith.constant 0 : i32
    %c0_i32_0 = arith.constant 0 : i32
    %c0_i32_1 = arith.constant 0 : i32
    return %c0_i32, %c0_i32_0 : i32, i32
  }
  func.func @transform_12(%arg0: i32) -> (i32, i32) {
    %c0_i32 = arith.constant 0 : i32
    %c0_i32_0 = arith.constant 0 : i32
    %c0_i32_1 = arith.constant 0 : i32
    return %c0_i32, %c0_i32_0 : i32, i32
  }
  func.func @transform_13(%arg0: i32) -> (i32, i32) {
    %c0_i32 = arith.constant 0 : i32
    %c0_i32_0 = arith.constant 0 : i32
    %c0_i32_1 = arith.constant 0 : i32
    return %c0_i32, %c0_i32_0 : i32, i32
  }
  func.func @transform_14(%arg0: i32) -> (i32, i32, i32) {
    %c0_i32 = arith.constant 0 : i32
    %c0_i32_0 = arith.constant 0 : i32
    %c0_i32_1 = arith.constant 0 : i32
    return %arg0, %c0_i32, %c0_i32_0 : i32, i32, i32
  }
}

</mosaic_0001>

<bundles_post_ra>
// kernel: mm_forward.1
= control target key start
LH: loop header
LB: loop body
LE: loop exit
PB: predicated region body
PF: predicated region fallthrough
CT: control target
= control target key end

     0   :  { %s1730_s29 = smov 0   ;;  %s2357_s0 = inlined_call_operand.vmem [shape: f32[2,8,256], index: 0, kind: input, shape index: {}]   ;;  %s2358_s1 = inlined_call_operand.vmem [shape: f32[2,8,256], index: 1, kind: input, shape index: {}]   ;;  %s2359_s2 = inlined_call_operand.vmem [shape: f32[8,8], index: 2, kind: input, shape index: {}]   ;;  %s2360_s3 = inlined_call_operand.vmem [shape: f32[8,1], index: 3, kind: input, shape index: {}]   ;;  %s2361_s4 = inlined_call_operand.vmem [shape: f32[9,8,1], index: 4, kind: input, shape index: {}]   ;;  %s2362_s5 = inlined_call_operand.vmem [shape: f32[8,1], index: 5, kind: input, shape index: {}]   ;;  %s2363_s6 = inlined_call_operand.vmem [shape: f32[16,8], index: 6, kind: input, shape index: {}]   ;;  %s2364_s7 = inlined_call_operand.vmem [shape: f32[16,1], index: 7, kind: input, shape index: {}]   ;;  %s2365_s8 = inlined_call_operand.vmem [shape: f32[9,16,1], index: 8, kind: input, shape index: {}]   ;;  %s2366_s9 = inlined_call_operand.vmem [shape: f32[16,1], index: 9, kind: input, shape index: {}]   ;;  %s2367_s10 = inlined_call_operand.vmem [shape: f32[8,1], index: 10, kind: input, shape index: {}]   ;;  %s2368_s11 = inlined_call_operand.vmem [shape: f32[8,8], index: 11, kind: input, shape index: {}]   ;;  %s2369_s12 = inlined_call_operand.vmem [shape: f32[8,8], index: 12, kind: input, shape index: {}]   ;;  %s2370_s13 = inlined_call_operand.vmem [shape: f32[8,1], index: 13, kind: input, shape index: {}]   ;;  %s2371_s14 = inlined_call_operand.vmem [shape: f32[2,8,256], index: 14, kind: output, shape index: {}]  }
   0x1 LB: > { %s1583_s30 = sadd.s32 4294967295, %s1642_s29   ;;  %p1587_p0 = scmp.ge.s32.totalorder %s1642_s29, 1  ;;  %s1642_s29 = sphi %s1730_s29, %s24_s29  }
   0x2   : > { %p422_p1 = scmp.lt.s32.totalorder %s1642_s29, 3 }
   0x4   : > { %p423_p2 = pnand %p1587_p0, %p422_p1 }
   0x6   : > { %426 = sbr.rel (%p423_p2) target bundleno = 1710 (0x6ae), region = 76 }
   0xd   : > { %p473_p3 = scmp.lt.s32.totalorder %s1583_s30, 1  ;;  %v2372_v0 = vmov 0   ;;  %v805_v1 = vld [vmem:[%s2364_s7] sm:$0xff]  ;;  %vm505_vm0 = vcmask 1043456   ;;  %v801_v13 = vld [vmem:[%s2363_s6 + $0x8] sm:$0xff]  ;;  %v913_v14 = vld [vmem:[%s2365_s8 + $0x70] sm:$0xff] }
   0xe   : > { %544 = vmatprep.mubr.bf16.mxu0 %v2372_v0  ;;  %858 = vmatprep.mubr.bf16.mxu1 %v2372_v0  ;;  %v495_v2 = vld [vmem:[%s2360_s3] sm:$0xff]  ;;  %v901_v16 = vld [vmem:[%s2365_s8 + $0x10] sm:$0xff]  ;;  %vm501_vm1 = vcmask 64512   ;;  %v587_v21 = vld [vmem:[%s2361_s4 + $0x38] sm:$0xff]  ;;  %vm553_vm2 = vcmask 138240   ;;  %v1645_v38 = vmov 0.0  }
   0xf   : > { %s2391_s30 = smov (!%p473_p3, %s1583_s30), 1  ;;  %1626 = vset.pattern.permute.xlu0 %v2372_v0  ;;  %1627 = vset.pattern.permute.xlu1 %v2372_v0  ;;  %v491_v3 = vld [vmem:[%s2359_s2] sm:$0xff]  ;;  %v581_v22 = vld [vmem:[%s2361_s4 + $0x8] sm:$0xff]  ;;  %v582_v27 = vld [vmem:[%s2361_s4 + $0x10] sm:$0xff]  ;;  %869 = vst.msk [vmem:[#allocation3] sm:$0xff] %vm553_vm2, %v1645_v38  ;;  %vm555_vm3 = vcmask 277640  }
  0x10   : > { %809 = vperm.xlu0 %1626, %v805_v1   ;;  %s1745_s17 = sshll.u32 %s2391_s30, 4  ;;  %v800_v4 = vld [vmem:[%s2363_s6] sm:$0xff]  ;;  %v492_v18 = vpack.c.bf16 %v491_v3, %v491_v3  ;;  %v905_v28 = vld [vmem:[%s2365_s8 + $0x30] sm:$0xff]  ;;  %v583_v32 = vld [vmem:[%s2361_s4 + $0x18] sm:$0xff]  ;;  %554 = vst.msk [vmem:[#allocation2] sm:$0xff] %vm553_vm2, %v1645_v38  ;;  %s1646_s15 = smov 17  }
  0x11   : > { %s477_s22 = scalar_lea.vmem %s2357_s0, %s1745_s17  ;;  %s482_s25 = scalar_lea.vmem %s2358_s1, %s1745_s17  ;;  %v907_v5 = vld [vmem:[%s2365_s8 + $0x40] sm:$0xff]  ;;  %v802_v20 = vpack.c.bf16 %v801_v13, %v800_v4  ;;  %v909_v30 = vld [vmem:[%s2365_s8 + $0x50] sm:$0xff]  ;;  %v585_v36 = vld [vmem:[%s2361_s4 + $0x28] sm:$0xff]  ;;  %870 = vst.msk [vmem:[#allocation3 + $0x18] sm:$0xff] %vm553_vm2, %v1645_v38  ;;  %vm567_vm4 = vcmask 1047688   ;;  %vm638_vm7 = vcmask 1031168  }
  0x12   : > { %v490_v6 = vld [vmem:[%s477_s22 + $0x8] sm:$0xff]  ;;  %v489_v8 = vld [vmem:[%s477_s22] sm:$0xff]  ;;  %1087 = vperm.xlu1 %1627, %v907_v5   ;;  %v586_v31 = vld [vmem:[%s2361_s4 + $0x30] sm:$0xff]  ;;  %556 = vst.msk [vmem:[#allocation2 + $0x10] sm:$0xff] %vm555_vm3, %v1645_v38  ;;  %s1647_s16 = smov 126   ;;  %s1648_s18 = smov 110  }
  0x13   : > { %v799_v7 = vld [vmem:[%s482_s25 + $0x8] sm:$0xff]  ;;  %v494_v9 = vpack.c.bf16 %v490_v6, %v490_v6  ;;  %v493_v11 = vpack.c.bf16 %v489_v8, %v489_v8  ;;  %v798_v12 = vld [vmem:[%s482_s25] sm:$0xff]  ;;  %871 = vst.msk [vmem:[#allocation3 + $0x10] sm:$0xff] %vm555_vm3, %v1645_v38  ;;  %872 = vst.msk [vmem:[#allocation3 + $0x28] sm:$0xff] %vm555_vm3, %v1645_v38  ;;  %s1649_s19 = smov 112   ;;  %s1650_s20 = smov 96  }
  0x14   : > { %v804_v10 = vpack.c.bf16 %v799_v7, %v799_v7  ;;  %498 = vperm.xlu0 %1626, %v495_v2   ;;  %v803_v15 = vpack.c.bf16 %v798_v12, %v798_v12  ;;  %v903_v23 = vld [vmem:[%s2365_s8 + $0x20] sm:$0xff]  ;;  %s2375_s21 = smov 94   ;;  %s1652_s23 = smov 127   ;;  %vm660_vm8 = vcmask 916480   ;;  %vm706_vm11 = vcmask 900096  }
  0x15   : > { %1594 = vmatprep.subr.msk.bf16.mxu0 %vm505_vm0, %v494_v9  ;;  %v507_v17 = vsel %vm505_vm0, %v493_v11, 0  ;;  %v584_v24 = vld [vmem:[%s2361_s4 + $0x20] sm:$0xff]  ;;  %s1653_s24 = smov 111   ;;  %s2373_s22 = smov 95   ;;  %vm728_vm12 = vcmask 785408   ;;  %vm774_vm13 = vcmask 769024  }
  0x16   : > { %1596 = vmatprep.subr.msk.bf16.mxu1 %vm505_vm0, %v804_v10  ;;  %513 = vmatpush1.bf16.msra.mxu0 %v507_v17  ;;  %v821_v19 = vsel %vm505_vm0, %v803_v15, 0  ;;  %v580_v25 = vld [vmem:[%s2361_s4] sm:$0xff]  ;;  %vm622_vm14 = vcmask 1039360   ;;  %vm693_vm15 = vcmask 908288   ;;  %vm761_vm3 = vcmask 777216   ;;  %s2389_s25 = smov 95  }
  0x17   : > { %1217 = vperm.xlu1 %1627, %v913_v14   ;;  %827 = vmatpush1.bf16.msra.mxu1 %v821_v19  ;;  %v899_v26 = vld [vmem:[%s2365_s8] sm:$0xff] }
  0x18   : > { %951 = vperm.xlu0 %1626, %v901_v16   ;;  %v911_v29 = vld [vmem:[%s2365_s8 + $0x60] sm:$0xff] }
  0x19   : > { %1595 = vmatmul.mubr.msk.bf16.vlgmr.msra.gmra.mrb[0].mxu0 %vm501_vm1, %v492_v18  ;;  %v588_v33 = vld [vmem:[%s2361_s4 + $0x40] sm:$0xff] }
  0x1a   : > { %1597 = vmatmul.mubr.msk.bf16.vlgmr.msra.gmra.mrb[0].mxu1 %vm501_vm1, %v802_v20  ;;  %v915_v34 = vld [vmem:[%s2365_s8 + $0x80] sm:$0xff] }
  0x1b   : > { %746 = vperm.xlu1 %1627, %v587_v21   ;;  %1445 = vmatprep.mubr.bf16.mxu1 %v2372_v0  ;;  %v790_v35 = vld [vmem:[%s2362_s5] sm:$0xff] }
  0x1c   : > { %607 = vperm.xlu0 %1626, %v581_v22   ;;  %v1303_v37 = vld [vmem:[%s2366_s9] sm:$0xff] }
  0x1f   : > { %1027 = vperm.xlu1 %1627, %v903_v23  }
  0x20   : > { %678 = vperm.xlu0 %1626, %v584_v24  }
  0x23   : > { %595 = vperm.xlu1 %1627, %v580_v25  }
  0x24   : > { %927 = vperm.xlu0 %1626, %v899_v26  }
  0x27   : > { %647 = vperm.xlu1 %1627, %v582_v27  }
  0x28   : > { %1069 = vperm.xlu0 %1626, %v905_v28  }
  0x2b   : > { %1199 = vperm.xlu1 %1627, %v911_v29  }
  0x2c   : > { %1157 = vperm.xlu0 %1626, %v909_v30  }
  0x2f   : > { %737 = vperm.xlu1 %1627, %v586_v31  }
  0x30   : > { %669 = vperm.xlu0 %1626, %v583_v32  }
  0x33   : > { %783 = vperm.xlu1 %1627, %v588_v33  }
  0x34   : > { %1287 = vperm.xlu0 %1626, %v915_v34  }
  0x37   : > { %793 = vperm.xlu1 %1627, %v790_v35  }
  0x38   : > { %715 = vperm.xlu0 %1626, %v585_v36  }
  0x3c   : > { %1307 = vperm.xlu0 %1626, %v1303_v37  }
  0x8f   : > { %v810_v39 = vpop.permute.xlu0 %809 }
  0x91   : > { %v1847_v54 = vpop.permute.xlu1 %1087 }
  0x93   : > { %v499_v40 = vpop.permute.xlu0 %498 }
  0x96   : > { %v1851_v56 = vpop.permute.xlu1 %1217 }
  0x97   : > { %v1845_v53 = vpop.permute.xlu0 %951 }
  0x9a   : > { %v1855_v58 = vpop.permute.xlu1 %746 }
  0x9b   : > { %v1849_v55 = vpop.permute.xlu0 %607 }
  0x9e   : > { %v1859_v60 = vpop.permute.xlu1 %1027 }
  0x9f   : > { %v1853_v57 = vpop.permute.xlu0 %678 }
  0xa2   : > { %v1863_v62 = vpop.permute.xlu1 %595 }
  0xa3   : > { %v1857_v59 = vpop.permute.xlu0 %927 }
  0xa6   : > { %v1867_v1 = vpop.permute.xlu1 %647 }
  0xa7   : > { %v1861_v61 = vpop.permute.xlu0 %1069 }
  0xaa   : > { %v1871_v3 = vpop.permute.xlu1 %1199 }
  0xab   : > { %v1865_v63 = vpop.permute.xlu0 %1157 }
  0xae   : > { %v1875_v5 = vpop.permute.xlu1 %737 }
  0xaf   : > { %v1869_v2 = vpop.permute.xlu0 %669 }
  0xb2   : > { %v1879_v7 = vpop.permute.xlu1 %783 }
  0xb3   : > { %v1873_v4 = vpop.permute.xlu0 %1287 }
  0xb6   : > { %v1883_v9 = vpop.permute.xlu1 %793 }
  0xb7   : > { %v1877_v6 = vpop.permute.xlu0 %715 }
  0xbb   : > { %v1881_v8 = vpop.permute.xlu0 %1307 }
  0xec   : > { %v546_v41 = vpop.f32.mrb[0].mxu0 }
  0xed   : > { %v860_v42 = vpop.f32.mrb[0].mxu1  ;;  %v548_v43 = vpop.f32.mrb[1].mxu0  ;;  %v547_v51 = vadd.f32 %v546_v41, %v499_v40 }
  0xee   : > { %v861_v44 = vadd.f32 %v860_v42, %v810_v39  ;;  %v549_v45 = vadd.f32 %v548_v43, %v499_v40  ;;  %v862_v46 = vpop.f32.mrb[1].mxu1  ;;  %v550_v47 = vpop.f32.mrb[2].mxu0 }
  0xef   : > { %v1837_v48 = vpop.f32.mrb[2].mxu1  ;;  %v551_v49 = vpop.f32.mrb[3].mxu0  ;;  %v863_v52 = vadd.f32 %v862_v46, %v810_v39 }
  0xf0   : > { %v1839_v50 = vpop.f32.mrb[3].mxu1  ;;  %877 = vrot.lane.b32.xlu1 %v861_v44, %s1646_s15  ;;  %561 = vrot.lane.b32.xlu0 %v549_v45, %s1646_s15 }
  0xf1   : > { %2377 = vst [vmem:[#allocation4_spill] sm:$0xff] %v1839_v50 }
  0xf4   : > { %559 = vrot.lane.b32.xlu1 %v547_v51, %s1646_s15 }
  0xf8   : > { %879 = vrot.lane.b32.xlu1 %v863_v52, %s1646_s15 }
 0x162   : > { %v878_v10 = vpop.permute.xlu1 %877  ;;  %v562_v11 = vpop.permute.xlu0 %561 }
 0x163   : > { %893 = vst.msk [vmem:[#allocation3] sm:$0xff] %vm567_vm4, %v878_v10 }
 0x164   : > { %570 = vst.msk [vmem:[#allocation2 + $0x10] sm:$0xff] %vm553_vm2, %v562_v11 }
 0x166   : > { %v560_v12 = vpop.permute.xlu1 %559 }
 0x167   : > { %v1888_v13 = vsel %vm553_vm2, %v560_v12, %v562_v11  ;;  %568 = vst.msk [vmem:[#allocation2] sm:$0xff] %vm567_vm4, %v560_v12 }
 0x168   : > { %v611_v32 = vmul.f32 %v1849_v55, %v1888_v13  ;;  %v682_v33 = vmul.f32 %v1853_v57, %v1888_v13  ;;  %v750_v37 = vmul.f32 %v1855_v58, %v1888_v13 }
 0x16a   : > { %v880_v14 = vpop.permute.xlu1 %879  ;;  %v1891_v15 = vld [vmem:[#allocation3] sm:$0xff] }
 0x16b   : > { %v1894_v16 = vsel %vm553_vm2, %v878_v10, %v880_v14  ;;  %895 = vst.msk [vmem:[#allocation3 + $0x10] sm:$0xff] %vm553_vm2, %v880_v14  ;;  %1001 = vrot.lane.b32.xlu0 %v1891_v15, %s1647_s16  ;;  %1131 = vrot.lane.b32.xlu1 %v1891_v15, %s1648_s18  ;;  %v959_v19 = vmul.f32 %v1845_v53, %v1891_v15  ;;  %v604_v20 = vld [vmem:[#allocation2 + $0x10] sm:$0xff]  ;;  %v571_v14 = vlaneseq }
 0x16c   : > { %v1095_v21 = vmul.f32 %v1847_v54, %v1891_v15  ;;  %v1225_v23 = vmul.f32 %v1851_v56, %v1891_v15  ;;  %v683_v25 = vmul.f32 %v1853_v57, %v604_v20  ;;  %v960_v28 = vmul.f32 %v1845_v53, %v1894_v16 }
 0x16d   : > { %v612_v29 = vmul.f32 %v1849_v55, %v604_v20  ;;  %v1096_v30 = vmul.f32 %v1847_v54, %v1894_v16  ;;  %v1226_v34 = vmul.f32 %v1851_v56, %v1894_v16  ;;  %v751_v36 = vmul.f32 %v1855_v58, %v604_v20 }
 0x16e   : > { %v1905_v17 = vld [vmem:[#allocation2] sm:$0xff] }
 0x16f   : > { %1043 = vrot.lane.b32.xlu0 %v1891_v15, %s1649_s19  ;;  %1173 = vrot.lane.b32.xlu1 %v1891_v15, %s1650_s20  ;;  %v610_v22 = vmul.f32 %v1849_v55, %v1905_v17  ;;  %v681_v24 = vmul.f32 %v1853_v57, %v1905_v17  ;;  %v749_v35 = vmul.f32 %v1855_v58, %v1905_v17 }
 0x172   : > { %v945_v18 = vld [vmem:[#allocation3 + $0x10] sm:$0xff] }
 0x173   : > { %1261 = vrot.lane.b32.xlu1 %v1891_v15, %s2375_s21  ;;  %632 = vrot.lane.b32.xlu0 %v1905_v17, %s1647_s16  ;;  %v961_v26 = vmul.f32 %v1845_v53, %v945_v18  ;;  %v1097_v27 = vmul.f32 %v1847_v54, %v945_v18  ;;  %v1227_v31 = vmul.f32 %v1851_v56, %v945_v18 }
 0x177   : > { %654 = vrot.lane.b32.xlu0 %v1905_v17, %s1649_s19  ;;  %1135 = vrot.lane.b32.xlu1 %v945_v18, %s1648_s18 }
 0x17b   : > { %700 = vrot.lane.b32.xlu0 %v1905_v17, %s1648_s18  ;;  %1177 = vrot.lane.b32.xlu1 %v945_v18, %s1650_s20 }
 0x17f   : > { %722 = vrot.lane.b32.xlu0 %v1905_v17, %s1650_s20  ;;  %1265 = vrot.lane.b32.xlu1 %v945_v18, %s2375_s21 }
 0x183   : > { %768 = vrot.lane.b32.xlu0 %v1905_v17, %s2375_s21  ;;  %1003 = vrot.lane.b32.xlu1 %v1894_v16, %s1647_s16 }
 0x187   : > { %1005 = vrot.lane.b32.xlu0 %v945_v18, %s1647_s16  ;;  %971 = vrot.lane.b32.xlu1 %v959_v19, %s1652_s23 }
 0x18b   : > { %1047 = vrot.lane.b32.xlu0 %v945_v18, %s1649_s19  ;;  %1045 = vrot.lane.b32.xlu1 %v1894_v16, %s1649_s19 }
 0x18f   : > { %636 = vrot.lane.b32.xlu0 %v604_v20, %s1647_s16  ;;  %634 = vrot.lane.b32.xlu1 %v1888_v13, %s1647_s16 }
 0x193   : > { %658 = vrot.lane.b32.xlu0 %v604_v20, %s1649_s19  ;;  %1107 = vrot.lane.b32.xlu1 %v1095_v21, %s1653_s24 }
 0x197   : > { %704 = vrot.lane.b32.xlu0 %v604_v20, %s1648_s18  ;;  %616 = vrot.lane.b32.xlu1 %v610_v22, %s1652_s23 }
 0x19b   : > { %726 = vrot.lane.b32.xlu0 %v604_v20, %s1650_s20  ;;  %656 = vrot.lane.b32.xlu1 %v1888_v13, %s1649_s19 }
 0x19f   : > { %1133 = vrot.lane.b32.xlu0 %v1894_v16, %s1648_s18  ;;  %702 = vrot.lane.b32.xlu1 %v1888_v13, %s1648_s18 }
 0x1a3   : > { %1175 = vrot.lane.b32.xlu0 %v1894_v16, %s1650_s20  ;;  %1237 = vrot.lane.b32.xlu1 %v1225_v23, %s2373_s22 }
 0x1a7   : > { %1263 = vrot.lane.b32.xlu0 %v1894_v16, %s2375_s21  ;;  %724 = vrot.lane.b32.xlu1 %v1888_v13, %s1650_s20 }
 0x1ab   : > { %687 = vrot.lane.b32.xlu0 %v681_v24, %s1653_s24  ;;  %770 = vrot.lane.b32.xlu1 %v1888_v13, %s2375_s21 }
 0x1af   : > { %691 = vrot.lane.b32.xlu0 %v683_v25, %s1653_s24  ;;  %975 = vrot.lane.b32.xlu1 %v961_v26, %s1652_s23 }
 0x1b3   : > { %1111 = vrot.lane.b32.xlu1 %v1097_v27, %s1653_s24  ;;  %973 = vrot.lane.b32.xlu0 %v960_v28, %s1652_s23 }
 0x1b7   : > { %620 = vrot.lane.b32.xlu1 %v612_v29, %s1652_s23  ;;  %1109 = vrot.lane.b32.xlu0 %v1096_v30, %s1653_s24 }
 0x1bb   : > { %1241 = vrot.lane.b32.xlu1 %v1227_v31, %s2373_s22  ;;  %618 = vrot.lane.b32.xlu0 %v611_v32, %s1652_s23 }
 0x1bf   : > { %689 = vrot.lane.b32.xlu1 %v682_v33, %s1653_s24  ;;  %1239 = vrot.lane.b32.xlu0 %v1226_v34, %s2373_s22 }
 0x1c3   : > { %755 = vrot.lane.b32.xlu1 %v749_v35, %s2373_s22  ;;  %772 = vrot.lane.b32.xlu0 %v604_v20, %s2375_s21  ;;  %v572_v20 = vand.u32 127, %v571_v14 }
 0x1c5   : > { %v573_v23 = vadd.s32 128, %v572_v20  ;;  %v574_v27 = vand.u32 15, %v572_v20 }
 0x1c7   : > { %759 = vrot.lane.b32.xlu1 %v751_v36, %s2373_s22  ;;  %757 = vrot.lane.b32.xlu0 %v750_v37, %s2373_s22  ;;  %v575_v26 = vand.u32 15, %v573_v23  ;;  %vm2031_vm6 = vcmp.ge.s32.totalorder %v574_v27, 1  ;;  %vm2042_vm9 = vcmp.le.s32.totalorder %v574_v27, 14 }
 0x1c8   : > { %v921_v36 = vsel %vm2031_vm6, %v1891_v15, 0.0  ;;  %v591_v14 = vsel %vm2031_vm6, %v1905_v17, 0.0 }
 0x1c9   : > { %vm2027_vm5 = vcmp.ge.s32.totalorder %v575_v26, 1  ;;  %vm2056_vm10 = vcmp.le.s32.totalorder %v575_v26, 14  ;;  %v935_v50 = vmul.f32 %v1857_v59, %v921_v36 }
 0x1ca   : > { %v592_v34 = vsel %vm2027_vm5, %v1888_v13, 0.0  ;;  %v922_v37 = vsel %vm2027_vm5, %v1894_v16, 0.0 }
 0x1cb   : > { %v936_v17 = vmul.f32 %v1857_v59, %v922_v37  ;;  %v2073_v26 = vmul.f32 %v1863_v62, %v592_v34 }
 0x1dd   : > { %v1002_v38 = vpop.permute.xlu0 %1001  ;;  %v1997_v39 = vpop.permute.xlu1 %1131 }
 0x1e1   : > { %v1044_v40 = vpop.permute.xlu0 %1043  ;;  %v1999_v41 = vpop.permute.xlu1 %1173 }
 0x1e5   : > { %v633_v42 = vpop.permute.xlu0 %632  ;;  %v2001_v43 = vpop.permute.xlu1 %1261 }
 0x1e9   : > { %v655_v44 = vpop.permute.xlu0 %654  ;;  %v2003_v45 = vpop.permute.xlu1 %1135 }
 0x1ed   : > { %v2005_v46 = vpop.permute.xlu0 %700  ;;  %v2007_v47 = vpop.permute.xlu1 %1177 }
 0x1f1   : > { %v2009_v49 = vpop.permute.xlu0 %722  ;;  %v2011_v51 = vpop.permute.xlu1 %1265 }
 0x1f5   : > { %v2013_v52 = vpop.permute.xlu0 %768  ;;  %v1004_v53 = vpop.permute.xlu1 %1003 }
 0x1f6   : > { %v1013_v20 = vsel %vm638_vm7, %v1002_v38, %v1004_v53  ;;  %v2070_v38 = vmul.f32 %v1863_v62, %v591_v14 }
 0x1f9   : > { %v1006_v54 = vpop.permute.xlu0 %1005  ;;  %v2015_v55 = vpop.permute.xlu1 %971 }
 0x1fa   : > { %v1014_v23 = vsel %vm638_vm7, %v1004_v53, %v1006_v54  ;;  %v1021_v53 = vsel %vm2042_vm9, %v1013_v20, 0.0 }
 0x1fb   : > { %v1035_v14 = vmul.f32 %v1859_v60, %v1021_v53 }
 0x1fd   : > { %v1048_v56 = vpop.permute.xlu0 %1047  ;;  %v1046_v57 = vpop.permute.xlu1 %1045 }
 0x1fe   : > { %v1055_v27 = vsel %vm660_vm8, %v1044_v40, %v1046_v57  ;;  %v1056_v16 = vsel %vm660_vm8, %v1046_v57, %v1048_v56  ;;  %v1022_v40 = vsel %vm2056_vm10, %v1014_v23, 0.0 }
 0x1ff   : > { %v1063_v54 = vsel %vm2031_vm6, %v1055_v27, 0.0  ;;  %v1064_v56 = vsel %vm2027_vm5, %v1056_v16, 0.0  ;;  %v1036_v20 = vmul.f32 %v1859_v60, %v1022_v40 }
 0x200   : > { %v1077_v23 = vmul.f32 %v1861_v61, %v1063_v54 }
 0x201   : > { %v637_v58 = vpop.permute.xlu0 %636  ;;  %v635_v10 = vpop.permute.xlu1 %634 }
 0x202   : > { %v639_v59 = vsel %vm638_vm7, %v633_v42, %v635_v10  ;;  %v640_v57 = vsel %vm638_vm7, %v635_v10, %v637_v58  ;;  %v1078_v42 = vmul.f32 %v1861_v61, %v1064_v56 }
 0x203   : > { %v643_v58 = vsel %vm2042_vm9, %v639_v59, 0.0  ;;  %v644_v10 = vsel %vm2056_vm10, %v640_v57, 0.0 }
 0x204   : > { %v650_v59 = vmul.f32 %v1867_v1, %v643_v58 }
 0x205   : > { %v659_v11 = vpop.permute.xlu0 %658  ;;  %v2017_v12 = vpop.permute.xlu1 %1107 }
 0x209   : > { %v2019_v18 = vpop.permute.xlu0 %704  ;;  %v2021_v19 = vpop.permute.xlu1 %616 }
 0x20d   : > { %v2023_v21 = vpop.permute.xlu0 %726  ;;  %v657_v22 = vpop.permute.xlu1 %656 }
 0x20e   : > { %v661_v36 = vsel %vm660_vm8, %v655_v44, %v657_v22  ;;  %v662_v37 = vsel %vm660_vm8, %v657_v22, %v659_v11 }
 0x20f   : > { %v665_v11 = vsel %vm2031_vm6, %v661_v36, 0.0  ;;  %v666_v60 = vsel %vm2027_vm5, %v662_v37, 0.0 }
 0x211   : > { %v1134_v24 = vpop.permute.xlu0 %1133  ;;  %v703_v25 = vpop.permute.xlu1 %702 }
 0x212   : > { %v1143_v44 = vsel %vm706_vm11, %v1997_v39, %v1134_v24  ;;  %v1144_v22 = vsel %vm706_vm11, %v1134_v24, %v2003_v45  ;;  %v707_v61 = vsel %vm706_vm11, %v2005_v46, %v703_v25  ;;  %v708_v53 = vsel %vm706_vm11, %v703_v25, %v2019_v18 }
 0x213   : > { %v1151_v56 = vsel %vm2042_vm9, %v1143_v44, 0.0  ;;  %v651_v18 = vmul.f32 %v1867_v1, %v644_v10  ;;  %v673_v25 = vmul.f32 %v1869_v2, %v666_v60  ;;  %v712_v1 = vsel %vm2056_vm10, %v708_v53, 0.0 }
 0x215   : > { %v1176_v28 = vpop.permute.xlu0 %1175  ;;  %v2025_v29 = vpop.permute.xlu1 %1237 }
 0x216   : > { %v1185_v39 = vsel %vm728_vm12, %v1999_v41, %v1176_v28  ;;  %v1186_v45 = vsel %vm728_vm12, %v1176_v28, %v2007_v47  ;;  %v672_v41 = vmul.f32 %v1869_v2, %v665_v11  ;;  %v1165_v28 = vmul.f32 %v1865_v63, %v1151_v56 }
 0x217   : > { %v1193_v57 = vsel %vm2031_vm6, %v1185_v39, 0.0  ;;  %v1194_v2 = vsel %vm2027_vm5, %v1186_v45, 0.0 }
 0x218   : > { %v1207_v44 = vmul.f32 %v1871_v3, %v1193_v57 }
 0x219   : > { %v2035_v32 = vpop.permute.xlu0 %1263  ;;  %v2037_v33 = vpop.permute.xlu1 %724 }
 0x21a   : > { %v1273_v37 = vsel %vm774_vm13, %v2001_v43, %v2035_v32  ;;  %v729_v43 = vsel %vm728_vm12, %v2009_v49, %v2037_v33 }
 0x21b   : > { %v733_v56 = vsel %vm2031_vm6, %v729_v43, 0.0 }
 0x21d   : > { %v2062_v0 = vpop.permute.xlu0 %687  ;;  %v2064_v15 = vpop.permute.xlu1 %770 }
 0x221   : > { %v2085_v62 = vpop.permute.xlu0 %691  ;;  %v976_v34 = vpop.permute.xlu1 %975 }
 0x225   : > { %v974_v27 = vpop.permute.xlu0 %973  ;;  %v1112_v16 = vpop.permute.xlu1 %1111 }
 0x226   : > { %v983_v40 = vsel %vm622_vm14, %v2015_v55, %v974_v27  ;;  %v984_v54 = vsel %vm622_vm14, %v974_v27, %v976_v34  ;;  %v1152_v55 = vsel %vm2056_vm10, %v1144_v22, 0.0  ;;  %v1208_v22 = vmul.f32 %v1871_v3, %v1194_v2 }
 0x227   : > { %v991_v46 = vadd.f32 %v983_v40, %v935_v50  ;;  %v992_v24 = vadd.f32 %v984_v54, %v936_v17  ;;  %v711_v17 = vsel %vm2042_vm9, %v707_v61, 0.0  ;;  %v1166_v10 = vmul.f32 %v1865_v63, %v1152_v55 }
 0x228   : > { %v1281_v63 = vsel %vm2042_vm9, %v1273_v37, 0.0  ;;  %v718_v39 = vmul.f32 %v1877_v6, %v711_v17  ;;  %v719_v40 = vmul.f32 %v1877_v6, %v712_v1  ;;  %v730_v54 = vsel %vm728_vm12, %v2037_v33, %v2023_v21 }
 0x229   : > { %v1039_v34 = vadd.f32 %v1035_v14, %v991_v46  ;;  %v1040_v36 = vadd.f32 %v1036_v20, %v992_v24  ;;  %v1110_v47 = vpop.permute.xlu0 %1109  ;;  %v621_v50 = vpop.permute.xlu1 %620  ;;  %v1274_v14 = vsel %vm774_vm13, %v2035_v32, %v2011_v51 }
 0x22a   : > { %v1119_v11 = vsel %vm693_vm15, %v2017_v12, %v1110_v47  ;;  %v1120_v60 = vsel %vm693_vm15, %v1110_v47, %v1112_v16 }
 0x22b   : > { %v1081_v20 = vadd.f32 %v1077_v23, %v1039_v34  ;;  %v1082_v58 = vadd.f32 %v1078_v42, %v1040_v36  ;;  %v1282_v23 = vsel %vm2056_vm10, %v1274_v14, 0.0 }
 0x22d   : > { %v1127_v61 = vadd.f32 %v1119_v11, %v1081_v20  ;;  %v1128_v27 = vadd.f32 %v1120_v60, %v1082_v58  ;;  %v619_v51 = vpop.permute.xlu0 %618  ;;  %v1242_v32 = vpop.permute.xlu1 %1241 }
 0x22e   : > { %v623_v12 = vsel %vm622_vm14, %v2021_v19, %v619_v51  ;;  %v624_v42 = vsel %vm622_vm14, %v619_v51, %v621_v50 }
 0x22f   : > { %v1169_v3 = vadd.f32 %v1165_v28, %v1127_v61  ;;  %v1170_v16 = vadd.f32 %v1166_v10, %v1128_v27  ;;  %v627_v53 = vadd.f32 %v623_v12, %v2070_v38  ;;  %v628_v49 = vadd.f32 %v624_v42, %v2073_v26 }
 0x230   : > { %v1295_v38 = vmul.f32 %v1873_v4, %v1281_v63  ;;  %v1296_v26 = vmul.f32 %v1873_v4, %v1282_v23 }
 0x231   : > { %v652_v19 = vadd.f32 %v650_v59, %v627_v53  ;;  %v653_v45 = vadd.f32 %v651_v18, %v628_v49  ;;  %v1240_v46 = vpop.permute.xlu0 %1239  ;;  %v1211_v24 = vadd.f32 %v1207_v44, %v1169_v3  ;;  %v1212_v55 = vadd.f32 %v1208_v22, %v1170_v16  ;;  %v690_v57 = vpop.permute.xlu1 %689 }
 0x232   : > { %v1249_v6 = vsel %vm761_vm3, %v2025_v29, %v1240_v46  ;;  %v1250_v34 = vsel %vm761_vm3, %v1240_v46, %v1242_v32  ;;  %v734_v59 = vsel %vm2027_vm5, %v730_v54, 0.0  ;;  %v775_v18 = vsel %vm774_vm13, %v2013_v52, %v2064_v15 }
 0x233   : > { %v1257_v36 = vadd.f32 %v1249_v6, %v1211_v24  ;;  %v1258_v21 = vadd.f32 %v1250_v34, %v1212_v55  ;;  %v674_v33 = vadd.f32 %v672_v41, %v652_v19  ;;  %v675_v47 = vadd.f32 %v673_v25, %v653_v45  ;;  %v902_v34 = vld [vmem:[%s2365_s8 + $0x18] sm:$0xff] }
 0x234   : > { %v694_v50 = vsel %vm693_vm15, %v2062_v0, %v690_v57  ;;  %v695_v4 = vsel %vm693_vm15, %v690_v57, %v2085_v62  ;;  %v740_v25 = vmul.f32 %v1875_v5, %v733_v56  ;;  %v741_v14 = vmul.f32 %v1875_v5, %v734_v59  ;;  %v2386_v57 = vld [vmem:[#allocation4_spill] sm:$0xff] }
 0x235   : > { %v1299_v29 = vadd.f32 %v1295_v38, %v1257_v36  ;;  %v1300_v28 = vadd.f32 %v1296_v26, %v1258_v21  ;;  %v698_v17 = vadd.f32 %v694_v50, %v674_v33  ;;  %v699_v1 = vadd.f32 %v695_v4, %v675_v47  ;;  %v773_v2 = vpop.permute.xlu0 %772  ;;  %v756_v41 = vpop.permute.xlu1 %755  ;;  %v908_v59 = vld [vmem:[%s2365_s8 + $0x48] sm:$0xff] }
 0x236   : > { %v776_v37 = vsel %vm774_vm13, %v2064_v15, %v773_v2  ;;  %v779_v62 = vsel %vm2042_vm9, %v775_v18, 0.0  ;;  %v914_v18 = vld [vmem:[%s2365_s8 + $0x78] sm:$0xff]  ;;  %v2387_v50 = vmov 0   ;;  %v900_v4 = vld [vmem:[%s2365_s8 + $0x8] sm:$0xff] }
 0x237   : > { %v720_v52 = vadd.f32 %v718_v39, %v698_v17  ;;  %v721_v20 = vadd.f32 %v719_v40, %v699_v1  ;;  %v1315_v0 = vadd.f32 %v1881_v8, %v1299_v29  ;;  %v780_v58 = vsel %vm2056_vm10, %v776_v37, 0.0  ;;  %v1381_v39 = vld [vmem:[%s2367_s10] sm:$0xff]  ;;  %v904_v29 = vld [vmem:[%s2365_s8 + $0x28] sm:$0xff] }
 0x238   : > { %v1316_v10 = vadd.f32 %v1881_v8, %v1300_v28  ;;  %v786_v27 = vmul.f32 %v1879_v7, %v779_v62  ;;  %v787_v51 = vmul.f32 %v1879_v7, %v780_v58  ;;  %v806_v7 = vld [vmem:[%s2364_s7 + $0x8] sm:$0xff]  ;;  %v906_v28 = vld [vmem:[%s2365_s8 + $0x38] sm:$0xff] }
 0x239   : > { %v758_v44 = vpop.permute.xlu0 %757  ;;  %v742_v11 = vadd.f32 %v740_v25, %v720_v52  ;;  %v743_v60 = vadd.f32 %v741_v14, %v721_v20  ;;  %v760_v22 = vpop.permute.xlu1 %759  ;;  %v1328_v43 = vmul.f32 %v1315_v0, %v1315_v0  ;;  %v912_v25 = vld [vmem:[%s2365_s8 + $0x68] sm:$0xff]  ;;  %v910_v62 = vld [vmem:[%s2365_s8 + $0x58] sm:$0xff] }
 0x23a   : > { %v762_v15 = vsel %vm761_vm3, %v756_v41, %v758_v44  ;;  %v763_v5 = vsel %vm761_vm3, %v758_v44, %v760_v22  ;;  %v1329_v61 = vmul.f32 %v1316_v10, %v1316_v10  ;;  %v916_v44 = vld [vmem:[%s2365_s8 + $0x88] sm:$0xff] }
 0x23b   : > { %v766_v32 = vadd.f32 %v762_v15, %v742_v11  ;;  %v767_v63 = vadd.f32 %v763_v5, %v743_v60  ;;  %v1304_v11 = vld [vmem:[%s2366_s9 + $0x8] sm:$0xff] }
 0x23c   : > { %v1330_v23 = vadd.f32 %v1329_v61, %v1328_v43  ;;  %v1388_v61 = vld [vmem:[%s2368_s11] sm:$0xff] }
 0x23d   : > { %v788_v12 = vadd.f32 %v786_v27, %v766_v32  ;;  %v789_v42 = vadd.f32 %v787_v51, %v767_v63 }
 0x23e   : > { %1331 = vadd.xlane.f32.xlu0 %v1330_v23 }
 0x23f   : > { %v796_v8 = vadd.f32 %v1883_v9, %v788_v12  ;;  %v797_v3 = vadd.f32 %v1883_v9, %v789_v42 }
 0x241   : > { %v1319_v16 = vmul.f32 %v796_v8, %v796_v8  ;;  %v1320_v53 = vmul.f32 %v797_v3, %v797_v3 }
 0x243   : > { %v1321_v49 = vadd.f32 %v1320_v53, %v1319_v16 }
 0x245   : > { %1322 = vadd.xlane.f32.xlu1 %v1321_v49 }
 0x254   : > { %1384 = vperm.xlu0 %1626, %v1381_v39  }
 0x256   : > { %814 = vperm.xlu1 %1627, %v806_v7  }
 0x2cb   : > { %v1332_v40 = vpop.xlane.xlu0 %1331 }
 0x2cc   : > { %v1333_v54 = vmax.f32 %v1332_v40, 1e-24 }
 0x2ce   : > { %1628 = vrsqrt.f32 %v1333_v54 }
 0x2d2   : > { %v1323_v56 = vpop.xlane.xlu1 %1322 }
 0x2d3   : > { %v1324_v19 = vmax.f32 %v1323_v56, 1e-24  ;;  %v1385_v15 = vpop.permute.xlu0 %1384 }
 0x2d5   : > { %1630 = vrsqrt.f32 %v1324_v19 }
 0x2d6   : > { %v815_v9 = vpop.permute.xlu1 %814 }
 0x2d7   : > { %v865_v45 = vadd.f32 %v1837_v48, %v815_v9  ;;  %v867_v38 = vadd.f32 %v2386_v57, %v815_v9 }
 0x2d8   : > { %v1629_v46 = vpop.eup %1628 }
 0x2d9   : > { %881 = vrot.lane.b32.xlu1 %v865_v45, %s1646_s15  ;;  %v1336_v24 = vmul.f32 %v1629_v46, %v1316_v10  ;;  %v1335_v55 = vmul.f32 %v1629_v46, %v1315_v0 }
 0x2db   : > { %v1340_v26 = vpack.c.bf16 %v1336_v24, %v1336_v24  ;;  %v1339_v6 = vpack.c.bf16 %v1335_v55, %v1335_v55 }
 0x2dd   : > { %1341 = vmatprep.subr.bf16.mxu0 %v1340_v26  ;;  %883 = vrot.lane.b32.xlu1 %v867_v38, %s1646_s15 }
 0x2de   : > { %1342 = vmatpush1.bf16.xpose.msra.mxu0 %v1339_v6 }
 0x2df   : > { %v1631_v36 = vpop.eup %1630 }
 0x2e0   : > { %v1327_v21 = vmul.f32 %v1631_v36, %v797_v3  ;;  %v1326_v48 = vmul.f32 %v1631_v36, %v796_v8 }
 0x2e1   : > { %956 = vperm.xlu1 %1627, %v902_v34  }
 0x2e2   : > { %v1338_v33 = vpack.c.bf16 %v1327_v21, %v1327_v21  ;;  %v1337_v47 = vpack.c.bf16 %v1326_v48, %v1326_v48 }
 0x2e4   : > { %1373 = vmatprep.mubr.bf16.mxu0 %v1338_v33 }
 0x2e5   : > { %1374 = vmatmul.mubr.bf16.vlgmr.msra.gmra.mrb[4].mxu0 %v1337_v47  ;;  %1092 = vperm.xlu1 %1627, %v908_v59  }
 0x2e6   : > { %1505 = vmatprep.mubr.bf16.mxu0 %v2387_v50 }
 0x2e9   : > { %1222 = vperm.xlu1 %1627, %v914_v18  }
 0x2ed   : > { %932 = vperm.xlu1 %1627, %v900_v4  }
 0x2f1   : > { %1032 = vperm.xlu1 %1627, %v904_v29  }
 0x2f5   : > { %1074 = vperm.xlu1 %1627, %v906_v28  }
 0x34b   : > { %v882_v17 = vpop.permute.xlu1 %881 }
 0x34c   : > { %896 = vst.msk [vmem:[#allocation3 + $0x18] sm:$0xff] %vm567_vm4, %v882_v17 }
 0x34f   : > { %v884_v1 = vpop.permute.xlu1 %883 }
 0x350   : > { %v2225_v2 = vsel %vm553_vm2, %v882_v17, %v884_v1  ;;  %898 = vst.msk [vmem:[#allocation3 + $0x28] sm:$0xff] %vm553_vm2, %v884_v1 }
 0x351   : > { %1009 = vrot.lane.b32.xlu0 %v2225_v2, %s1647_s16  ;;  %v924_v26 = vsel %vm2027_vm5, %v2225_v2, 0.0 }
 0x353   : > { %v2230_v41 = vld [vmem:[#allocation3 + $0x18] sm:$0xff] }
 0x354   : > { %1007 = vrot.lane.b32.xlu1 %v2230_v41, %s1647_s16  ;;  %v923_v9 = vsel %vm2031_vm6, %v2230_v41, 0.0 }
 0x355   : > { %1051 = vrot.lane.b32.xlu0 %v2225_v2, %s1649_s19 }
 0x357   : > { %v948_v37 = vld [vmem:[#allocation3 + $0x28] sm:$0xff] }
 0x358   : > { %1011 = vrot.lane.b32.xlu1 %v948_v37, %s1647_s16  ;;  %s487_s16 = scalar_lea.vmem %s2371_s14, %s1745_s17 }
 0x359   : > { %1204 = vperm.xlu0 %1626, %v912_v25  }
 0x35d   : > { %1139 = vrot.lane.b32.xlu0 %v2225_v2, %s1648_s18 }
 0x360   : > { %v957_v14 = vpop.permute.xlu1 %956 }
 0x361   : > { %v962_v52 = vmul.f32 %v957_v14, %v2230_v41  ;;  %v963_v20 = vmul.f32 %v957_v14, %v2225_v2  ;;  %v964_v0 = vmul.f32 %v957_v14, %v948_v37 }
 0x363   : > { %977 = vrot.lane.b32.xlu1 %v962_v52, %s1652_s23 }
 0x364   : > { %v1093_v58 = vpop.permute.xlu1 %1092 }
 0x365   : > { %v1099_v10 = vmul.f32 %v1093_v58, %v2225_v2  ;;  %v1098_v16 = vmul.f32 %v1093_v58, %v2230_v41  ;;  %v1100_v49 = vmul.f32 %v1093_v58, %v948_v37 }
 0x367   : > { %979 = vrot.lane.b32.xlu1 %v963_v20, %s1652_s23 }
 0x368   : > { %v2266_v60 = vpop.permute.xlu1 %1222 }
 0x369   : > { %v1228_v22 = vmul.f32 %v2266_v60, %v2230_v41  ;;  %v1230_v43 = vmul.f32 %v2266_v60, %v948_v37 }
 0x36b   : > { %981 = vrot.lane.b32.xlu1 %v964_v0, %s1652_s23 }
 0x36c   : > { %v933_v42 = vpop.permute.xlu1 %932 }
 0x36d   : > { %v937_v24 = vmul.f32 %v933_v42, %v923_v9  ;;  %v938_v21 = vmul.f32 %v933_v42, %v924_v26 }
 0x36f   : > { %1162 = vperm.xlu1 %1627, %v910_v62  }
 0x370   : > { %v1033_v8 = vpop.permute.xlu1 %1032 }
 0x373   : > { %1049 = vrot.lane.b32.xlu1 %v2230_v41, %s1649_s19 }
 0x374   : > { %v1075_v3 = vpop.permute.xlu1 %1074 }
 0x377   : > { %1053 = vrot.lane.b32.xlu1 %v948_v37, %s1649_s19 }
 0x37b   : > { %1137 = vrot.lane.b32.xlu1 %v2230_v41, %s1648_s18 }
 0x37f   : > { %1141 = vrot.lane.b32.xlu1 %v948_v37, %s1648_s18  ;;  %s2388_s18 = smov 94  }
 0x383   : > { %1115 = vrot.lane.b32.xlu1 %v1099_v10, %s1653_s24 }
 0x387   : > { %1292 = vperm.xlu1 %1627, %v916_v44  }
 0x38b   : > { %1181 = vrot.lane.b32.xlu1 %v2225_v2, %s1650_s20 }
 0x38f   : > { %1312 = vperm.xlu1 %1627, %v1304_v11   ;;  %v1229_v11 = vmul.f32 %v2266_v60, %v2225_v2 }
 0x393   : > { %1269 = vrot.lane.b32.xlu1 %v2225_v2, %s2388_s18 }
 0x397   : > { %1243 = vrot.lane.b32.xlu1 %v1228_v22, %s2389_s25  ;;  %v1458_v22 = vld [vmem:[%s2370_s13] sm:$0xff] }
 0x39b   : > { %1247 = vrot.lane.b32.xlu1 %v1230_v43, %s2389_s25 }
 0x3b8   : > { %v1375_v5 = vpop.f32.mrb[4].mxu0 }
 0x3b9   : > { %v1387_v27 = vmul.f32 %v1385_v15, %v1375_v5  ;;  %v1377_v51 = vpop.f32.mrb[5].mxu0 }
 0x3ba   : > { %v1378_v32 = vpop.f32.mrb[6].mxu0 }
 0x3bb   : > { %v1379_v63 = vpop.f32.mrb[7].mxu0  ;;  %v1389_v23 = vadd.f32 %v1388_v61, %v1387_v27 }
 0x3bd   : > { %v1390_v12 = vsel %vm501_vm1, %v1389_v23, -inf }
 0x3be   : > { %1391 = vmax.xlane.f32.xlu0 %v1390_v12 }
 0x3c3   : > { %v1010_v56 = vpop.permute.xlu0 %1009 }
 0x3c6   : > { %v1008_v53 = vpop.permute.xlu1 %1007 }
 0x3c7   : > { %v1015_v19 = vsel %vm638_vm7, %v1008_v53, %v1010_v56  ;;  %v1052_v6 = vpop.permute.xlu0 %1051 }
 0x3c8   : > { %v1023_v55 = vsel %vm2042_vm9, %v1015_v19, 0.0 }
 0x3c9   : > { %v1037_v48 = vmul.f32 %v1033_v8, %v1023_v55 }
 0x3ca   : > { %v1012_v39 = vpop.permute.xlu1 %1011 }
 0x3cb   : > { %v1016_v57 = vsel %vm638_vm7, %v1010_v56, %v1012_v39 }
 0x3cc   : > { %v1024_v47 = vsel %vm2056_vm10, %v1016_v57, 0.0 }
 0x3cd   : > { %v1038_v28 = vmul.f32 %v1033_v8, %v1024_v47 }
 0x3d4   : > { %1113 = vrot.lane.b32.xlu0 %v1098_v16, %s1653_s24 }
 0x3d5   : > { %v978_v7 = vpop.permute.xlu1 %977 }
 0x3d8   : > { %1117 = vrot.lane.b32.xlu0 %v1100_v49, %s1653_s24  ;;  %v1205_v52 = vpop.permute.xlu0 %1204 }
 0x3d9   : > { %v980_v40 = vpop.permute.xlu1 %979 }
 0x3da   : > { %v985_v45 = vsel %vm622_vm14, %v978_v7, %v980_v40 }
 0x3db   : > { %v993_v38 = vadd.f32 %v985_v45, %v937_v24 }
 0x3dc   : > { %1179 = vrot.lane.b32.xlu0 %v2230_v41, %s1650_s20  ;;  %v1140_v20 = vpop.permute.xlu0 %1139 }
 0x3dd   : > { %v982_v54 = vpop.permute.xlu1 %981  ;;  %v1041_v18 = vadd.f32 %v1037_v48, %v993_v38 }
 0x3de   : > { %v986_v34 = vsel %vm622_vm14, %v980_v40, %v982_v54 }
 0x3df   : > { %v994_v50 = vadd.f32 %v986_v34, %v938_v21 }
 0x3e0   : > { %1183 = vrot.lane.b32.xlu0 %v948_v37, %s1650_s20 }
 0x3e1   : > { %v1042_v25 = vadd.f32 %v1038_v28, %v994_v50 }
 0x3e4   : > { %1267 = vrot.lane.b32.xlu0 %v2230_v41, %s2388_s18 }
 0x3e8   : > { %1271 = vrot.lane.b32.xlu0 %v948_v37, %s2388_s18 }
 0x3ee   : > { %v2293_v46 = vpop.permute.xlu1 %1162 }
 0x3f2   : > { %v1050_v36 = vpop.permute.xlu1 %1049 }
 0x3f3   : > { %v1057_v33 = vsel %vm660_vm8, %v1050_v36, %v1052_v6 }
 0x3f4   : > { %v1065_v59 = vsel %vm2031_vm6, %v1057_v33, 0.0 }
 0x3f5   : > { %v1079_v4 = vmul.f32 %v1075_v3, %v1065_v59 }
 0x3f6   : > { %v1054_v29 = vpop.permute.xlu1 %1053 }
 0x3f7   : > { %v1058_v17 = vsel %vm660_vm8, %v1052_v6, %v1054_v29  ;;  %v1083_v1 = vadd.f32 %v1079_v4, %v1041_v18 }
 0x3f8   : > { %v1066_v41 = vsel %vm2027_vm5, %v1058_v17, 0.0 }
 0x3f9   : > { %v1080_v37 = vmul.f32 %v1075_v3, %v1066_v41 }
 0x3fa   : > { %v1138_v43 = vpop.permute.xlu1 %1137 }
 0x3fb   : > { %v1084_v14 = vadd.f32 %v1080_v37, %v1042_v25  ;;  %v1145_v2 = vsel %vm706_vm11, %v1138_v43, %v1140_v20 }
 0x3fc   : > { %v1153_v39 = vsel %vm2042_vm9, %v1145_v2, 0.0 }
 0x3fd   : > { %v1167_v24 = vmul.f32 %v2293_v46, %v1153_v39 }
 0x3fe   : > { %v1142_v15 = vpop.permute.xlu1 %1141 }
 0x3ff   : > { %v1146_v60 = vsel %vm706_vm11, %v1140_v20, %v1142_v15 }
 0x400   : > { %v1154_v7 = vsel %vm2056_vm10, %v1146_v60, 0.0 }
 0x401   : > { %v1168_v55 = vmul.f32 %v2293_v46, %v1154_v7 }
 0x402   : > { %v1116_v61 = vpop.permute.xlu1 %1115 }
 0x406   : > { %v1293_v51 = vpop.permute.xlu1 %1292 }
 0x40a   : > { %v1182_v63 = vpop.permute.xlu1 %1181 }
 0x40e   : > { %v1313_v12 = vpop.permute.xlu1 %1312 }
 0x412   : > { %v1270_v8 = vpop.permute.xlu1 %1269 }
 0x416   : > { %v1244_v19 = vpop.permute.xlu1 %1243 }
 0x41a   : > { %v1248_v48 = vpop.permute.xlu1 %1247 }
 0x44b   : > { %v1392_v0 = vpop.xlane.xlu0 %1391 }
 0x44c   : > { %v1393_v62 = vsub.f32 %v1389_v23, %v1392_v0 }
 0x44e   : > { %v1394_v58 = vmul.f32 1.442695, %v1393_v62 }
 0x44f   : > { %v1114_v5 = vpop.permute.xlu0 %1113 }
 0x450   : > { %1632 = vpow2.f32 %v1394_v58  ;;  %v1121_v53 = vsel %vm693_vm15, %v1114_v5, %v1116_v61 }
 0x451   : > { %v1129_v9 = vadd.f32 %v1121_v53, %v1083_v1 }
 0x453   : > { %v1118_v27 = vpop.permute.xlu0 %1117  ;;  %v1171_v31 = vadd.f32 %v1167_v24, %v1129_v9 }
 0x454   : > { %v1122_v49 = vsel %vm693_vm15, %v1116_v61, %v1118_v27 }
 0x455   : > { %v1130_v45 = vadd.f32 %v1122_v49, %v1084_v14 }
 0x457   : > { %v1180_v32 = vpop.permute.xlu0 %1179  ;;  %v1172_v36 = vadd.f32 %v1168_v55, %v1130_v45 }
 0x458   : > { %v1187_v3 = vsel %vm728_vm12, %v1180_v32, %v1182_v63 }
 0x459   : > { %v1195_v54 = vsel %vm2031_vm6, %v1187_v3, 0.0 }
 0x45a   : > { %v1633_v10 = vpop.eup %1632  ;;  %v1209_v57 = vmul.f32 %v1205_v52, %v1195_v54 }
 0x45b   : > { %v1396_v44 = vsel %vm501_vm1, %v1633_v10, 0.0  ;;  %v1184_v23 = vpop.permute.xlu0 %1183 }
 0x45c   : > { %1397 = vadd.xlane.f32.xlu0 %v1396_v44  ;;  %v1188_v16 = vsel %vm728_vm12, %v1182_v63, %v1184_v23  ;;  %v1213_v47 = vadd.f32 %v1209_v57, %v1171_v31  ;;  %v1454_v44 = vld [vmem:[%s2369_s12] sm:$0xff] }
 0x45d   : > { %v1196_v56 = vsel %vm2027_vm5, %v1188_v16, 0.0  ;;  %v1455_v15 = vpack.c.bf16 %v1454_v44, %v1454_v44 }
 0x45e   : > { %v1210_v38 = vmul.f32 %v1205_v52, %v1196_v56 }
 0x45f   : > { %v1268_v42 = vpop.permute.xlu0 %1267 }
 0x460   : > { %v1275_v26 = vsel %vm774_vm13, %v1268_v42, %v1270_v8  ;;  %v1214_v46 = vadd.f32 %v1210_v38, %v1172_v36 }
 0x461   : > { %v1283_v30 = vsel %vm2042_vm9, %v1275_v26, 0.0 }
 0x462   : > { %v1297_v50 = vmul.f32 %v1293_v51, %v1283_v30 }
 0x463   : > { %v1272_v40 = vpop.permute.xlu0 %1271 }
 0x464   : > { %v1276_v6 = vsel %vm774_vm13, %v1270_v8, %v1272_v40 }
 0x465   : > { %v1284_v21 = vsel %vm2056_vm10, %v1276_v6, 0.0 }
 0x466   : > { %v1298_v4 = vmul.f32 %v1293_v51, %v1284_v21 }
 0x472   : > { %1245 = vrot.lane.b32.xlu0 %v1229_v11, %s2389_s25 }
 0x476   : > { %1461 = vperm.xlu0 %1626, %v1458_v22  }
 0x4e9   : > { %v1398_v34 = vpop.xlane.xlu0 %1397 }
 0x4ea   : > { %1634 = vrcp.f32 %v1398_v34 }
 0x4ed   : > { %v1246_v33 = vpop.permute.xlu0 %1245 }
 0x4ee   : > { %v1251_v59 = vsel %vm761_vm3, %v1244_v19, %v1246_v33  ;;  %v1252_v18 = vsel %vm761_vm3, %v1246_v33, %v1248_v48 }
 0x4ef   : > { %v1259_v29 = vadd.f32 %v1251_v59, %v1213_v47  ;;  %v1260_v28 = vadd.f32 %v1252_v18, %v1214_v46 }
 0x4f1   : > { %v1301_v17 = vadd.f32 %v1297_v50, %v1259_v29  ;;  %v1302_v1 = vadd.f32 %v1298_v4, %v1260_v28 }
 0x4f3   : > { %v1318_v41 = vadd.f32 %v1313_v12, %v1302_v1  ;;  %v1317_v35 = vadd.f32 %v1313_v12, %v1301_v17 }
 0x4f4   : > { %v1635_v25 = vpop.eup %1634 }
 0x4f5   : > { %v1400_v37 = vmul.f32 %v1635_v25, %v1633_v10  ;;  %v1403_v13 = vpack.c.bf16 %v1318_v41, %v1318_v41  ;;  %v1402_v14 = vpack.c.bf16 %v1317_v35, %v1317_v35  ;;  %v1462_v5 = vpop.permute.xlu0 %1461 }
 0x4f7   : > { %1598 = vmatprep.subr.msk.bf16.mxu1 %vm505_vm0, %v1403_v13  ;;  %v1408_v52 = vsel %vm505_vm0, %v1402_v14, 0  ;;  %v1401_v20 = vpack.c.bf16 %v1400_v37, %v1400_v37 }
 0x4f8   : > { %1414 = vmatpush1.bf16.msra.mxu1 %v1408_v52 }
 0x4fb   : > { %1599 = vmatmul.mubr.msk.bf16.vlgmr.msra.gmra.mrb[4].mxu1 %vm501_vm1, %v1401_v20 }
 0x5ce   : > { %v1447_v0 = vpop.f32.mrb[4].mxu1 }
 0x5cf   : > { %v1456_v62 = vpack.c.bf16 %v1447_v0, %v1447_v0  ;;  %v1449_v58 = vpop.f32.mrb[5].mxu1 }
 0x5d0   : > { %v1457_v11 = vpack.c.bf16 %v1449_v58, %v1449_v58  ;;  %v1451_v10 = vpop.f32.mrb[6].mxu1 }
 0x5d1   : > { %v1468_v22 = vsel %vm505_vm0, %v1456_v62, 0  ;;  %v1452_v43 = vpop.f32.mrb[7].mxu1 }
 0x5d2   : > { %1600 = vmatprep.subr.msk.bf16.mxu0 %vm505_vm0, %v1457_v11 }
 0x5d3   : > { %1474 = vmatpush1.bf16.msra.mxu0 %v1468_v22 }
 0x5d6   : > { %1601 = vmatmul.mubr.msk.bf16.vlgmr.msra.gmra.mrb[8].mxu0 %vm501_vm1, %v1455_v15 }
 0x6a9   : > { %v1507_v61 = vpop.f32.mrb[8].mxu0 }
 0x6aa   : > { %v1508_v27 = vadd.f32 %v1507_v61, %v1462_v5  ;;  %v1509_v51 = vpop.f32.mrb[9].mxu0 }
 0x6ab   : > { %v1510_v32 = vadd.f32 %v1509_v51, %v1462_v5  ;;  %v1511_v63 = vpop.f32.mrb[10].mxu0 }
 0x6ac   : > { %1514 = vst [vmem:[%s487_s16] sm:$0xff] %v1508_v27  ;;  %v1512_v23 = vpop.f32.mrb[11].mxu0 }
 0x6ad   : > { %1515 = vst [vmem:[%s487_s16 + $0x8] sm:$0xff] %v1510_v32 }
 0x6ae PF: > { %s24_s29 = sadd.s32 1, %s1642_s29  }
 0x6af   : > { %p21_p4 = scmp.ge.s32.totalorder %s24_s29, 4  }
 0x6b1   :  { %23 = sbr.rel (!%p21_p4) target bundleno = 1 (0x1), region = 109 }

</bundles_post_ra>
